<compile_context>
chip_gen: v5e
topology: v5e:2x2
jax: 0.10.0
libtpu: 0.0.40
codegen_flags: <defaults>
</compile_context>

<pallas_src>
import functools

import jax
import jax.numpy as jnp
from jax.experimental import pallas as pl
from jax.experimental.pallas import tpu as pltpu


_VMEM_LIMIT = 32 * 1024 * 1024  # safe scoped-VMEM request on v5e/v6e/v7x


def _pick_tile(dim, candidates):
    """Largest tile that evenly divides `dim`, else the full dim (always legal:
    a full-extent block satisfies the (8,128) tiling rule)."""
    for c in candidates:
        if dim % c == 0:
            return c
    return dim


# --------------------------- tiled projection kernels ------------------------

def _qkv_matmul_kernel(x_ref, w_ref, o_ref, acc_ref):
    # grid = (part, M//tm, d//tn, K//tk); k (reduction) is innermost.
    @pl.when(pl.program_id(3) == 0)
    def _():
        acc_ref[...] = jnp.zeros_like(acc_ref)

    acc_ref[...] += jnp.dot(x_ref[...], w_ref[0],
                            preferred_element_type=jnp.float32)

    @pl.when(pl.program_id(3) == pl.num_programs(3) - 1)
    def _():
        o_ref[0] = acc_ref[...].astype(o_ref.dtype)


def _qkv_projection(x2d, w3):
    """(M, K) @ (3, K, d) -> (3, M, d): q/k/v come out pre-separated."""
    M, K = x2d.shape
    n_parts, K2, d = w3.shape
    assert n_parts == 3 and K2 == K
    tm = _pick_tile(M, (256, 128))
    tn = _pick_tile(d, (256, 128))
    tk = _pick_tile(K, (512, 256, 128))
    grid = (3, M // tm, d // tn, K // tk)
    return pl.pallas_call(
        _qkv_matmul_kernel,
        out_shape=jax.ShapeDtypeStruct((3, M, d), x2d.dtype),
        grid_spec=pltpu.PrefetchScalarGridSpec(
            num_scalar_prefetch=0,
            grid=grid,
            in_specs=[
                pl.BlockSpec((tm, tk), lambda p, i, j, k: (i, k)),
                pl.BlockSpec((1, tk, tn), lambda p, i, j, k: (p, k, j)),
            ],
            out_specs=pl.BlockSpec((1, tm, tn), lambda p, i, j, k: (p, i, j)),
            scratch_shapes=[pltpu.VMEM((tm, tn), jnp.float32)],
        ),
        compiler_params=pltpu.CompilerParams(
            dimension_semantics=("parallel", "parallel", "parallel", "arbitrary"),
            vmem_limit_bytes=_VMEM_LIMIT,
        ),
    )(x2d, w3)


def _matmul_bias_kernel(x_ref, w_ref, b_ref, o_ref, acc_ref):
    @pl.when(pl.program_id(2) == 0)
    def _():
        acc_ref[...] = jnp.zeros_like(acc_ref)

    acc_ref[...] += jnp.dot(x_ref[...], w_ref[...],
                            preferred_element_type=jnp.float32)

    # Bias added only on the final reduction step (correct under k-tiling).
    @pl.when(pl.program_id(2) == pl.num_programs(2) - 1)
    def _():
        o_ref[...] = (acc_ref[...] + b_ref[...].astype(jnp.float32)
                      ).astype(o_ref.dtype)


def _fc_matmul(x2d, w, bias):
    M, K = x2d.shape
    K2, N = w.shape
    assert K2 == K
    tm = _pick_tile(M, (256, 128))
    tn = _pick_tile(N, (256, 128))
    tk = _pick_tile(K, (512, 256, 128))
    grid = (M // tm, N // tn, K // tk)
    return pl.pallas_call(
        _matmul_bias_kernel,
        out_shape=jax.ShapeDtypeStruct((M, N), x2d.dtype),
        grid_spec=pltpu.PrefetchScalarGridSpec(
            num_scalar_prefetch=0,
            grid=grid,
            in_specs=[
                pl.BlockSpec((tm, tk), lambda i, j, k: (i, k)),
                pl.BlockSpec((tk, tn), lambda i, j, k: (k, j)),
                pl.BlockSpec((1, tn), lambda i, j, k: (0, j)),
            ],
            out_specs=pl.BlockSpec((tm, tn), lambda i, j, k: (i, j)),
            scratch_shapes=[pltpu.VMEM((tm, tn), jnp.float32)],
        ),
        compiler_params=pltpu.CompilerParams(
            dimension_semantics=("parallel", "parallel", "arbitrary"),
            vmem_limit_bytes=_VMEM_LIMIT,
        ),
    )(x2d, w, bias.reshape(1, N))


# ------------------------------ attention kernel ----------------------------

def _attn_kernel(q_ref, k_ref, v_ref, o_ref, *, scale):
    # Blocks are (1, h, tn, dh) in the module's (pre-transpose) reshaped
    # layout.  The softmax reduction axis is the key-head axis g (size h) at
    # every position, so every position in this tile is independent.  All ops
    # stay in the well-supported elementwise / minor-axis-reduce /
    # unit-minor-broadcast set (no in-kernel transposes or reshapes).
    h = q_ref.shape[1]
    qh = q_ref[0].astype(jnp.float32) * scale   # (h, tn, dh)
    kh = k_ref[0].astype(jnp.float32)           # (h, tn, dh)
    vh = v_ref[0].astype(jnp.float32)           # (h, tn, dh)

    # Scores against each key-head g, concatenated on the minor (lane) axis so
    # the softmax reduce is a cheap lane-axis reduce: s[hh, nn, gg].
    s = jnp.concatenate(
        [jnp.sum(qh * kh[g], axis=-1, keepdims=True) for g in range(h)],
        axis=-1)                                             # (h, tn, h)

    m = jnp.max(s, axis=-1, keepdims=True)                   # (h, tn, 1)
    e = jnp.exp(s - m)                                       # (h, tn, h)
    denom = jnp.sum(e, axis=-1, keepdims=True)               # (h, tn, 1)
    p = e * pl.reciprocal(denom, approx=True)                # softmax (EUP recip)

    acc = jnp.zeros(vh.shape, jnp.float32)                   # (h, tn, dh)
    for g in range(h):
        acc = acc + p[:, :, g:g + 1] * vh[g]                 # (h,tn,1)*(tn,dh)

    # Already the post-`.transpose(1, 2)` layout: out[hh, nn, :].
    o_ref[0] = acc.astype(o_ref.dtype)


def _pallas_attention(qkv4, b, scale):
    """qkv4: (3*b, h, n, dh) with q rows [0,b), k rows [b,2b), v rows [2b,3b)."""
    _, h, n, dh = qkv4.shape
    # Positions are independent -> tile the sequence axis (keeps VMEM bounded
    # for long sequences); both grid axes are parallel (megacore-friendly).
    tn = _pick_tile(n, (1024, 512, 256, 128, 64, 32, 16, 8))
    grid = (b, n // tn)
    blk = (1, h, tn, dh)
    return pl.pallas_call(
        functools.partial(_attn_kernel, scale=scale),
        out_shape=jax.ShapeDtypeStruct((b, h, n, dh), qkv4.dtype),
        grid_spec=pltpu.PrefetchScalarGridSpec(
            num_scalar_prefetch=0,
            grid=grid,
            in_specs=[
                pl.BlockSpec(blk, lambda bi, ni: (bi, 0, ni, 0)),
                pl.BlockSpec(blk, lambda bi, ni: (b + bi, 0, ni, 0)),
                pl.BlockSpec(blk, lambda bi, ni: (2 * b + bi, 0, ni, 0)),
            ],
            out_specs=pl.BlockSpec(blk, lambda bi, ni: (bi, 0, ni, 0)),
        ),
        compiler_params=pltpu.CompilerParams(
            dimension_semantics=("parallel", "parallel"),
            vmem_limit_bytes=_VMEM_LIMIT,
        ),
    )(qkv4, qkv4, qkv4)


# ------------------------------ forward pass ---------------------------------

def self_attention_forward(x, params, *, heads):
    b, n, d = x.shape
    h = heads
    assert d % h == 0, "dim must be divisible by heads"
    dh = d // h

    x2d = x.reshape(b * n, d)

    # qkv projection (no bias).  Output layout (3, b*n, d): PyTorch's
    # `.chunk(3, dim=-1)` is folded into the output routing of the matmul.
    qkv3 = _qkv_projection(x2d, params["w_qkv"])          # (3, b*n, d)

    # Exactly PyTorch's t.reshape(b, h, n, dh) (the seq/feature-mixing
    # reshape): contiguous -> free XLA reshape, no in-kernel relayout.
    qkv4 = qkv3.reshape(3 * b, h, n, dh)

    # Fused attention; result is already in the post-`.transpose(1, 2)`
    # (b, h, n, dh) layout.
    attn = _pallas_attention(qkv4, b, 1.0 / (dh ** 0.5))  # (b, h, n, dh)

    # Exactly PyTorch's final `.reshape(b, n, d)`: contiguous -> free reshape.
    attn2d = attn.reshape(b * n, d)

    out = _fc_matmul(attn2d, params["w_fc"], params["b_fc"])
    return out.reshape(b, n, d)


# ------------------------------ reference & setup ----------------------------

def _reference_forward(x, params, *, heads):
    """Pure-JAX mirror of the PyTorch module (for correctness checking)."""
    b, n, d = x.shape
    h = heads
    dh = d // h
    qkv = jnp.einsum('md,pdk->pmk', x.reshape(b * n, d), params["w_qkv"])
    q, k, v = [t.reshape(b, h, n, dh).transpose(0, 2, 1, 3) for t in qkv]
    s = jnp.einsum('bnhd,bngd->bnhg', q, k) / (dh ** 0.5)
    p = jax.nn.softmax(s, axis=-1)
    o = jnp.einsum('bnhg,bngd->bnhd', p, v)              # (b, n, h, dh)
    o = o.transpose(0, 2, 1, 3).reshape(b * n, d)        # (b,h,n,dh) -> (bn, d)
    return (o @ params["w_fc"] + params["b_fc"]).reshape(b, n, d)


def init_params(key, dim):
    """Mimic PyTorch Linear default init (uniform +-1/sqrt(in_features)).

    w_qkv is stored as (3, in, out_per_part): w_qkv[p, i, o] == W_pt[p*dim+o, i].
    w_fc is stored transposed as (in, out) so y = x @ w_fc + b_fc.
    """
    k1, k2, k3 = jax.random.split(key, 3)
    bound = 1.0 / (dim ** 0.5)
    w_qkv = jax.random.uniform(k1, (3, dim, dim), jnp.float32, -bound, bound)
    w_fc = jax.random.uniform(k2, (dim, dim), jnp.float32, -bound, bound)
    b_fc = jax.random.uniform(k3, (dim,), jnp.float32, -bound, bound)
    return {"w_qkv": w_qkv, "w_fc": w_fc, "b_fc": b_fc}


if __name__ == "__main__":
    key = jax.random.PRNGKey(0)
    b, n, d, heads = 2, 8, 32, 8

    kx, kp = jax.random.split(key)
    x = jax.random.normal(kx, (b, n, d), dtype=jnp.float32)
    params = init_params(kp, d)

    fwd = jax.jit(functools.partial(self_attention_forward, heads=heads))
    out = fwd(x, params)
    jax.block_until_ready(out)

    assert out.shape == (b, n, d), out.shape
    assert out.dtype == jnp.float32

    ref = _reference_forward(x, params, heads=heads)
    assert jnp.allclose(out, ref, rtol=1e-2, atol=1e-2), \
        float(jnp.max(jnp.abs(out - ref)))

    print("KERNEL_OK")
</pallas_src>

<mosaic_0001>
module attributes {stable_mosaic.version = 11 : i64} {
  func.func @_qkv_matmul_kernel(%arg0: i32, %arg1: i32, %arg2: i32, %arg3: i32, %arg4: memref<16x32xf32, #tpu.memory_space<vmem>>, %arg5: memref<1x32x32xf32, #tpu.memory_space<vmem>>, %arg6: memref<1x16x32xf32, #tpu.memory_space<vmem>>, %arg7: memref<16x32xf32, #tpu.memory_space<vmem>>) attributes {dimension_semantics = [#tpu.dimension_semantics<parallel>, #tpu.dimension_semantics<parallel>, #tpu.dimension_semantics<parallel>, #tpu.dimension_semantics<arbitrary>], iteration_bounds = array<i64: 3, 1, 1, 1>, scalar_prefetch = 0 : i64, scratch_operands = 1 : i64, tpu.core_type = #tpu.core_type<tc>, window_params = [{transform_indices = @transform_0, window_bounds = array<i64: 16, 32>}, {transform_indices = @transform_1, window_bounds = array<i64: 1, 32, 32>}, {transform_indices = @transform_2, window_bounds = array<i64: 1, 16, 32>}]} {
    %c0_i32 = arith.constant 0 : i32
    %0 = arith.cmpi eq, %arg3, %c0_i32 : i32
    %1 = arith.extui %0 : i1 to i32
    %c0_i32_0 = arith.constant 0 : i32
    %2 = arith.cmpi ne, %1, %c0_i32_0 : i32
    scf.if %2 {
      %cst_11 = arith.constant 0.000000e+00 : f32
      %13 = vector.broadcast %cst_11 : f32 to vector<16x32xf32>
      %c0_12 = arith.constant 0 : index
      %c0_13 = arith.constant 0 : index
      %14 = vector.load %arg7[%c0_12, %c0_13] : memref<16x32xf32, #tpu.memory_space<vmem>>, vector<16x32xf32>
      tpu.vector_store %arg7[%c0_12, %c0_13], %13 {strides = array<i32>} : memref<16x32xf32, #tpu.memory_space<vmem>>, vector<16x32xf32>,
    } else {
    }
    %c0 = arith.constant 0 : index
    %c0_1 = arith.constant 0 : index
    %3 = vector.load %arg7[%c0, %c0_1] : memref<16x32xf32, #tpu.memory_space<vmem>>, vector<16x32xf32>
    %c0_2 = arith.constant 0 : index
    %c0_3 = arith.constant 0 : index
    %4 = vector.load %arg4[%c0_2, %c0_3] : memref<16x32xf32, #tpu.memory_space<vmem>>, vector<16x32xf32>
    %c0_4 = arith.constant 0 : index
    %c0_5 = arith.constant 0 : index
    %c0_6 = arith.constant 0 : index
    %5 = vector.load %arg5[%c0_4, %c0_5, %c0_6] : memref<1x32x32xf32, #tpu.memory_space<vmem>>, vector<1x32x32xf32>
    %6 = vector.shape_cast %5 : vector<1x32x32xf32> to vector<32x32xf32>
    %cst = arith.constant dense<0.000000e+00> : vector<16x32xf32>
    %7 = tpu.matmul %4, %6, %cst {dimension_numbers = #tpu.dot_dimension_numbers<[1], [0], [0], [1], [0, 0, 1, 1], [], []>} : vector<16x32xf32>, vector<32x32xf32>, vector<16x32xf32> -> vector<16x32xf32>
    %8 = arith.addf %3, %7 : vector<16x32xf32>
    %c0_7 = arith.constant 0 : index
    %c0_8 = arith.constant 0 : index
    %9 = vector.load %arg7[%c0_7, %c0_8] : memref<16x32xf32, #tpu.memory_space<vmem>>, vector<16x32xf32>
    tpu.vector_store %arg7[%c0_7, %c0_8], %8 {strides = array<i32>} : memref<16x32xf32, #tpu.memory_space<vmem>>, vector<16x32xf32>,
    %c0_i32_9 = arith.constant 0 : i32
    %10 = arith.cmpi eq, %arg3, %c0_i32_9 : i32
    %11 = arith.extui %10 : i1 to i32
    %c0_i32_10 = arith.constant 0 : i32
    %12 = arith.cmpi ne, %11, %c0_i32_10 : i32
    scf.if %12 {
      %c0_11 = arith.constant 0 : index
      %c0_12 = arith.constant 0 : index
      %13 = vector.load %arg7[%c0_11, %c0_12] : memref<16x32xf32, #tpu.memory_space<vmem>>, vector<16x32xf32>
      %c0_13 = arith.constant 0 : index
      %c0_14 = arith.constant 0 : index
      %c0_15 = arith.constant 0 : index
      %14 = vector.load %arg6[%c0_13, %c0_14, %c0_15] : memref<1x16x32xf32, #tpu.memory_space<vmem>>, vector<1x16x32xf32>
      %15 = vector.shape_cast %14 : vector<1x16x32xf32> to vector<16x32xf32>
      %16 = vector.shape_cast %13 : vector<16x32xf32> to vector<1x16x32xf32>
      tpu.vector_store %arg6[%c0_13, %c0_14, %c0_15], %16 {strides = array<i32>} : memref<1x16x32xf32, #tpu.memory_space<vmem>>, vector<1x16x32xf32>,
    } else {
    }
    return
  }
  func.func @transform_0(%arg0: i32, %arg1: i32, %arg2: i32, %arg3: i32) -> (i32, i32) {
    %c0_i32 = arith.constant 0 : i32
    return %arg1, %arg3 : i32, i32
  }
  func.func @transform_1(%arg0: i32, %arg1: i32, %arg2: i32, %arg3: i32) -> (i32, i32, i32) {
    %c0_i32 = arith.constant 0 : i32
    return %arg0, %arg3, %arg2 : i32, i32, i32
  }
  func.func @transform_2(%arg0: i32, %arg1: i32, %arg2: i32, %arg3: i32) -> (i32, i32, i32) {
    %c0_i32 = arith.constant 0 : i32
    return %arg0, %arg1, %arg2 : i32, i32, i32
  }
}

module attributes {stable_mosaic.version = 11 : i64} {
  func.func @_attn_kernel(%arg0: i32, %arg1: i32, %arg2: memref<1x8x8x4xf32, #tpu.memory_space<vmem>>, %arg3: memref<1x8x8x4xf32, #tpu.memory_space<vmem>>, %arg4: memref<1x8x8x4xf32, #tpu.memory_space<vmem>>, %arg5: memref<1x8x8x4xf32, #tpu.memory_space<vmem>>) attributes {dimension_semantics = [#tpu.dimension_semantics<parallel>, #tpu.dimension_semantics<parallel>], iteration_bounds = array<i64: 2, 1>, scalar_prefetch = 0 : i64, scratch_operands = 0 : i64, tpu.core_type = #tpu.core_type<tc>, window_params = [{transform_indices = @transform_0, window_bounds = array<i64: 1, 8, 8, 4>}, {transform_indices = @transform_1, window_bounds = array<i64: 1, 8, 8, 4>}, {transform_indices = @transform_2, window_bounds = array<i64: 1, 8, 8, 4>}, {transform_indices = @transform_3, window_bounds = array<i64: 1, 8, 8, 4>}]} {
    %c0 = arith.constant 0 : index
    %c0_0 = arith.constant 0 : index
    %c0_1 = arith.constant 0 : index
    %c0_2 = arith.constant 0 : index
    %0 = vector.load %arg2[%c0, %c0_0, %c0_1, %c0_2] : memref<1x8x8x4xf32, #tpu.memory_space<vmem>>, vector<1x8x8x4xf32>
    %1 = vector.shape_cast %0 : vector<1x8x8x4xf32> to vector<8x8x4xf32>
    %cst = arith.constant 5.000000e-01 : f32
    %2 = vector.broadcast %cst : f32 to vector<8x8x4xf32>
    %3 = arith.mulf %1, %2 : vector<8x8x4xf32>
    %c0_3 = arith.constant 0 : index
    %c0_4 = arith.constant 0 : index
    %c0_5 = arith.constant 0 : index
    %c0_6 = arith.constant 0 : index
    %4 = vector.load %arg3[%c0_3, %c0_4, %c0_5, %c0_6] : memref<1x8x8x4xf32, #tpu.memory_space<vmem>>, vector<1x8x8x4xf32>
    %5 = vector.shape_cast %4 : vector<1x8x8x4xf32> to vector<8x8x4xf32>
    %c0_7 = arith.constant 0 : index
    %c0_8 = arith.constant 0 : index
    %c0_9 = arith.constant 0 : index
    %c0_10 = arith.constant 0 : index
    %6 = vector.load %arg4[%c0_7, %c0_8, %c0_9, %c0_10] : memref<1x8x8x4xf32, #tpu.memory_space<vmem>>, vector<1x8x8x4xf32>
    %7 = vector.shape_cast %6 : vector<1x8x8x4xf32> to vector<8x8x4xf32>
    %8 = vector.extract_strided_slice %5 {offsets = [0, 0, 0], sizes = [1, 8, 4], strides = [1, 1, 1]} : vector<8x8x4xf32> to vector<1x8x4xf32>
    %9 = vector.shape_cast %8 : vector<1x8x4xf32> to vector<8x4xf32>
    %10 = vector.shape_cast %9 : vector<8x4xf32> to vector<1x8x4xf32>
    %11 = vector.broadcast %10 : vector<1x8x4xf32> to vector<8x8x4xf32>
    %12 = arith.mulf %3, %11 : vector<8x8x4xf32>
    %cst_11 = arith.constant dense<0.000000e+00> : vector<8x8xf32>
    %13 = vector.multi_reduction <add>, %12, %cst_11 [2] : vector<8x8x4xf32> to vector<8x8xf32>
    %14 = vector.shape_cast %13 : vector<8x8xf32> to vector<8x8x1xf32>
    %15 = vector.extract_strided_slice %5 {offsets = [1, 0, 0], sizes = [1, 8, 4], strides = [1, 1, 1]} : vector<8x8x4xf32> to vector<1x8x4xf32>
    %16 = vector.shape_cast %15 : vector<1x8x4xf32> to vector<8x4xf32>
    %17 = vector.shape_cast %16 : vector<8x4xf32> to vector<1x8x4xf32>
    %18 = vector.broadcast %17 : vector<1x8x4xf32> to vector<8x8x4xf32>
    %19 = arith.mulf %3, %18 : vector<8x8x4xf32>
    %cst_12 = arith.constant dense<0.000000e+00> : vector<8x8xf32>
    %20 = vector.multi_reduction <add>, %19, %cst_12 [2] : vector<8x8x4xf32> to vector<8x8xf32>
    %21 = vector.shape_cast %20 : vector<8x8xf32> to vector<8x8x1xf32>
    %22 = vector.extract_strided_slice %5 {offsets = [2, 0, 0], sizes = [1, 8, 4], strides = [1, 1, 1]} : vector<8x8x4xf32> to vector<1x8x4xf32>
    %23 = vector.shape_cast %22 : vector<1x8x4xf32> to vector<8x4xf32>
    %24 = vector.shape_cast %23 : vector<8x4xf32> to vector<1x8x4xf32>
    %25 = vector.broadcast %24 : vector<1x8x4xf32> to vector<8x8x4xf32>
    %26 = arith.mulf %3, %25 : vector<8x8x4xf32>
    %cst_13 = arith.constant dense<0.000000e+00> : vector<8x8xf32>
    %27 = vector.multi_reduction <add>, %26, %cst_13 [2] : vector<8x8x4xf32> to vector<8x8xf32>
    %28 = vector.shape_cast %27 : vector<8x8xf32> to vector<8x8x1xf32>
    %29 = vector.extract_strided_slice %5 {offsets = [3, 0, 0], sizes = [1, 8, 4], strides = [1, 1, 1]} : vector<8x8x4xf32> to vector<1x8x4xf32>
    %30 = vector.shape_cast %29 : vector<1x8x4xf32> to vector<8x4xf32>
    %31 = vector.shape_cast %30 : vector<8x4xf32> to vector<1x8x4xf32>
    %32 = vector.broadcast %31 : vector<1x8x4xf32> to vector<8x8x4xf32>
    %33 = arith.mulf %3, %32 : vector<8x8x4xf32>
    %cst_14 = arith.constant dense<0.000000e+00> : vector<8x8xf32>
    %34 = vector.multi_reduction <add>, %33, %cst_14 [2] : vector<8x8x4xf32> to vector<8x8xf32>
    %35 = vector.shape_cast %34 : vector<8x8xf32> to vector<8x8x1xf32>
    %36 = vector.extract_strided_slice %5 {offsets = [4, 0, 0], sizes = [1, 8, 4], strides = [1, 1, 1]} : vector<8x8x4xf32> to vector<1x8x4xf32>
    %37 = vector.shape_cast %36 : vector<1x8x4xf32> to vector<8x4xf32>
    %38 = vector.shape_cast %37 : vector<8x4xf32> to vector<1x8x4xf32>
    %39 = vector.broadcast %38 : vector<1x8x4xf32> to vector<8x8x4xf32>
    %40 = arith.mulf %3, %39 : vector<8x8x4xf32>
    %cst_15 = arith.constant dense<0.000000e+00> : vector<8x8xf32>
    %41 = vector.multi_reduction <add>, %40, %cst_15 [2] : vector<8x8x4xf32> to vector<8x8xf32>
    %42 = vector.shape_cast %41 : vector<8x8xf32> to vector<8x8x1xf32>
    %43 = vector.extract_strided_slice %5 {offsets = [5, 0, 0], sizes = [1, 8, 4], strides = [1, 1, 1]} : vector<8x8x4xf32> to vector<1x8x4xf32>
    %44 = vector.shape_cast %43 : vector<1x8x4xf32> to vector<8x4xf32>
    %45 = vector.shape_cast %44 : vector<8x4xf32> to vector<1x8x4xf32>
    %46 = vector.broadcast %45 : vector<1x8x4xf32> to vector<8x8x4xf32>
    %47 = arith.mulf %3, %46 : vector<8x8x4xf32>
    %cst_16 = arith.constant dense<0.000000e+00> : vector<8x8xf32>
    %48 = vector.multi_reduction <add>, %47, %cst_16 [2] : vector<8x8x4xf32> to vector<8x8xf32>
    %49 = vector.shape_cast %48 : vector<8x8xf32> to vector<8x8x1xf32>
    %50 = vector.extract_strided_slice %5 {offsets = [6, 0, 0], sizes = [1, 8, 4], strides = [1, 1, 1]} : vector<8x8x4xf32> to vector<1x8x4xf32>
    %51 = vector.shape_cast %50 : vector<1x8x4xf32> to vector<8x4xf32>
    %52 = vector.shape_cast %51 : vector<8x4xf32> to vector<1x8x4xf32>
    %53 = vector.broadcast %52 : vector<1x8x4xf32> to vector<8x8x4xf32>
    %54 = arith.mulf %3, %53 : vector<8x8x4xf32>
    %cst_17 = arith.constant dense<0.000000e+00> : vector<8x8xf32>
    %55 = vector.multi_reduction <add>, %54, %cst_17 [2] : vector<8x8x4xf32> to vector<8x8xf32>
    %56 = vector.shape_cast %55 : vector<8x8xf32> to vector<8x8x1xf32>
    %57 = vector.extract_strided_slice %5 {offsets = [7, 0, 0], sizes = [1, 8, 4], strides = [1, 1, 1]} : vector<8x8x4xf32> to vector<1x8x4xf32>
    %58 = vector.shape_cast %57 : vector<1x8x4xf32> to vector<8x4xf32>
    %59 = vector.shape_cast %58 : vector<8x4xf32> to vector<1x8x4xf32>
    %60 = vector.broadcast %59 : vector<1x8x4xf32> to vector<8x8x4xf32>
    %61 = arith.mulf %3, %60 : vector<8x8x4xf32>
    %cst_18 = arith.constant dense<0.000000e+00> : vector<8x8xf32>
    %62 = vector.multi_reduction <add>, %61, %cst_18 [2] : vector<8x8x4xf32> to vector<8x8xf32>
    %63 = vector.shape_cast %62 : vector<8x8xf32> to vector<8x8x1xf32>
    %64 = tpu.concatenate %14, %21, %28, %35, %42, %49, %56, %63 in 2 : vector<8x8x1xf32>, vector<8x8x1xf32>, vector<8x8x1xf32>, vector<8x8x1xf32>, vector<8x8x1xf32>, vector<8x8x1xf32>, vector<8x8x1xf32>, vector<8x8x1xf32> -> vector<8x8x8xf32>
    %cst_19 = arith.constant dense<0xFF800000> : vector<8x8xf32>
    %65 = vector.multi_reduction <maximumf>, %64, %cst_19 [2] : vector<8x8x8xf32> to vector<8x8xf32>
    %66 = vector.shape_cast %65 : vector<8x8xf32> to vector<8x8x1xf32>
    %67 = vector.broadcast %66 : vector<8x8x1xf32> to vector<8x8x8xf32>
    %68 = arith.subf %64, %67 : vector<8x8x8xf32>
    %69 = math.exp %68 : vector<8x8x8xf32>
    %cst_20 = arith.constant dense<0.000000e+00> : vector<8x8xf32>
    %70 = vector.multi_reduction <add>, %69, %cst_20 [2] : vector<8x8x8xf32> to vector<8x8xf32>
    %71 = vector.shape_cast %70 : vector<8x8xf32> to vector<8x8x1xf32>
    %72 = tpu.reciprocal %71 {approx = true} : vector<8x8x1xf32> -> vector<8x8x1xf32>
    %73 = vector.broadcast %72 : vector<8x8x1xf32> to vector<8x8x8xf32>
    %74 = arith.mulf %69, %73 : vector<8x8x8xf32>
    %cst_21 = arith.constant 0.000000e+00 : f32
    %75 = vector.broadcast %cst_21 : f32 to vector<8x8x4xf32>
    %76 = vector.extract_strided_slice %74 {offsets = [0, 0, 0], sizes = [8, 8, 1], strides = [1, 1, 1]} : vector<8x8x8xf32> to vector<8x8x1xf32>
    %77 = vector.extract_strided_slice %7 {offsets = [0, 0, 0], sizes = [1, 8, 4], strides = [1, 1, 1]} : vector<8x8x4xf32> to vector<1x8x4xf32>
    %78 = vector.shape_cast %77 : vector<1x8x4xf32> to vector<8x4xf32>
    %79 = vector.shape_cast %78 : vector<8x4xf32> to vector<1x8x4xf32>
    %80 = vector.broadcast %76 : vector<8x8x1xf32> to vector<8x8x4xf32>
    %81 = vector.broadcast %79 : vector<1x8x4xf32> to vector<8x8x4xf32>
    %82 = arith.mulf %80, %81 : vector<8x8x4xf32>
    %83 = arith.addf %75, %82 : vector<8x8x4xf32>
    %84 = vector.extract_strided_slice %74 {offsets = [0, 0, 1], sizes = [8, 8, 1], strides = [1, 1, 1]} : vector<8x8x8xf32> to vector<8x8x1xf32>
    %85 = vector.extract_strided_slice %7 {offsets = [1, 0, 0], sizes = [1, 8, 4], strides = [1, 1, 1]} : vector<8x8x4xf32> to vector<1x8x4xf32>
    %86 = vector.shape_cast %85 : vector<1x8x4xf32> to vector<8x4xf32>
    %87 = vector.shape_cast %86 : vector<8x4xf32> to vector<1x8x4xf32>
    %88 = vector.broadcast %84 : vector<8x8x1xf32> to vector<8x8x4xf32>
    %89 = vector.broadcast %87 : vector<1x8x4xf32> to vector<8x8x4xf32>
    %90 = arith.mulf %88, %89 : vector<8x8x4xf32>
    %91 = arith.addf %83, %90 : vector<8x8x4xf32>
    %92 = vector.extract_strided_slice %74 {offsets = [0, 0, 2], sizes = [8, 8, 1], strides = [1, 1, 1]} : vector<8x8x8xf32> to vector<8x8x1xf32>
    %93 = vector.extract_strided_slice %7 {offsets = [2, 0, 0], sizes = [1, 8, 4], strides = [1, 1, 1]} : vector<8x8x4xf32> to vector<1x8x4xf32>
    %94 = vector.shape_cast %93 : vector<1x8x4xf32> to vector<8x4xf32>
    %95 = vector.shape_cast %94 : vector<8x4xf32> to vector<1x8x4xf32>
    %96 = vector.broadcast %92 : vector<8x8x1xf32> to vector<8x8x4xf32>
    %97 = vector.broadcast %95 : vector<1x8x4xf32> to vector<8x8x4xf32>
    %98 = arith.mulf %96, %97 : vector<8x8x4xf32>
    %99 = arith.addf %91, %98 : vector<8x8x4xf32>
    %100 = vector.extract_strided_slice %74 {offsets = [0, 0, 3], sizes = [8, 8, 1], strides = [1, 1, 1]} : vector<8x8x8xf32> to vector<8x8x1xf32>
    %101 = vector.extract_strided_slice %7 {offsets = [3, 0, 0], sizes = [1, 8, 4], strides = [1, 1, 1]} : vector<8x8x4xf32> to vector<1x8x4xf32>
    %102 = vector.shape_cast %101 : vector<1x8x4xf32> to vector<8x4xf32>
    %103 = vector.shape_cast %102 : vector<8x4xf32> to vector<1x8x4xf32>
    %104 = vector.broadcast %100 : vector<8x8x1xf32> to vector<8x8x4xf32>
    %105 = vector.broadcast %103 : vector<1x8x4xf32> to vector<8x8x4xf32>
    %106 = arith.mulf %104, %105 : vector<8x8x4xf32>
    %107 = arith.addf %99, %106 : vector<8x8x4xf32>
    %108 = vector.extract_strided_slice %74 {offsets = [0, 0, 4], sizes = [8, 8, 1], strides = [1, 1, 1]} : vector<8x8x8xf32> to vector<8x8x1xf32>
    %109 = vector.extract_strided_slice %7 {offsets = [4, 0, 0], sizes = [1, 8, 4], strides = [1, 1, 1]} : vector<8x8x4xf32> to vector<1x8x4xf32>
    %110 = vector.shape_cast %109 : vector<1x8x4xf32> to vector<8x4xf32>
    %111 = vector.shape_cast %110 : vector<8x4xf32> to vector<1x8x4xf32>
    %112 = vector.broadcast %108 : vector<8x8x1xf32> to vector<8x8x4xf32>
    %113 = vector.broadcast %111 : vector<1x8x4xf32> to vector<8x8x4xf32>
    %114 = arith.mulf %112, %113 : vector<8x8x4xf32>
    %115 = arith.addf %107, %114 : vector<8x8x4xf32>
    %116 = vector.extract_strided_slice %74 {offsets = [0, 0, 5], sizes = [8, 8, 1], strides = [1, 1, 1]} : vector<8x8x8xf32> to vector<8x8x1xf32>
    %117 = vector.extract_strided_slice %7 {offsets = [5, 0, 0], sizes = [1, 8, 4], strides = [1, 1, 1]} : vector<8x8x4xf32> to vector<1x8x4xf32>
    %118 = vector.shape_cast %117 : vector<1x8x4xf32> to vector<8x4xf32>
    %119 = vector.shape_cast %118 : vector<8x4xf32> to vector<1x8x4xf32>
    %120 = vector.broadcast %116 : vector<8x8x1xf32> to vector<8x8x4xf32>
    %121 = vector.broadcast %119 : vector<1x8x4xf32> to vector<8x8x4xf32>
    %122 = arith.mulf %120, %121 : vector<8x8x4xf32>
    %123 = arith.addf %115, %122 : vector<8x8x4xf32>
    %124 = vector.extract_strided_slice %74 {offsets = [0, 0, 6], sizes = [8, 8, 1], strides = [1, 1, 1]} : vector<8x8x8xf32> to vector<8x8x1xf32>
    %125 = vector.extract_strided_slice %7 {offsets = [6, 0, 0], sizes = [1, 8, 4], strides = [1, 1, 1]} : vector<8x8x4xf32> to vector<1x8x4xf32>
    %126 = vector.shape_cast %125 : vector<1x8x4xf32> to vector<8x4xf32>
    %127 = vector.shape_cast %126 : vector<8x4xf32> to vector<1x8x4xf32>
    %128 = vector.broadcast %124 : vector<8x8x1xf32> to vector<8x8x4xf32>
    %129 = vector.broadcast %127 : vector<1x8x4xf32> to vector<8x8x4xf32>
    %130 = arith.mulf %128, %129 : vector<8x8x4xf32>
    %131 = arith.addf %123, %130 : vector<8x8x4xf32>
    %132 = vector.extract_strided_slice %74 {offsets = [0, 0, 7], sizes = [8, 8, 1], strides = [1, 1, 1]} : vector<8x8x8xf32> to vector<8x8x1xf32>
    %133 = vector.extract_strided_slice %7 {offsets = [7, 0, 0], sizes = [1, 8, 4], strides = [1, 1, 1]} : vector<8x8x4xf32> to vector<1x8x4xf32>
    %134 = vector.shape_cast %133 : vector<1x8x4xf32> to vector<8x4xf32>
    %135 = vector.shape_cast %134 : vector<8x4xf32> to vector<1x8x4xf32>
    %136 = vector.broadcast %132 : vector<8x8x1xf32> to vector<8x8x4xf32>
    %137 = vector.broadcast %135 : vector<1x8x4xf32> to vector<8x8x4xf32>
    %138 = arith.mulf %136, %137 : vector<8x8x4xf32>
    %139 = arith.addf %131, %138 : vector<8x8x4xf32>
    %c0_22 = arith.constant 0 : index
    %c0_23 = arith.constant 0 : index
    %c0_24 = arith.constant 0 : index
    %c0_25 = arith.constant 0 : index
    %140 = vector.load %arg5[%c0_22, %c0_23, %c0_24, %c0_25] : memref<1x8x8x4xf32, #tpu.memory_space<vmem>>, vector<1x8x8x4xf32>
    %141 = vector.shape_cast %140 : vector<1x8x8x4xf32> to vector<8x8x4xf32>
    %142 = vector.shape_cast %139 : vector<8x8x4xf32> to vector<1x8x8x4xf32>
    tpu.vector_store %arg5[%c0_22, %c0_23, %c0_24, %c0_25], %142 {strides = array<i32>} : memref<1x8x8x4xf32, #tpu.memory_space<vmem>>, vector<1x8x8x4xf32>,
    return
  }
  func.func @transform_0(%arg0: i32, %arg1: i32) -> (i32, i32, i32, i32) {
    %c0_i32 = arith.constant 0 : i32
    %c0_i32_0 = arith.constant 0 : i32
    %c0_i32_1 = arith.constant 0 : i32
    return %arg0, %c0_i32, %arg1, %c0_i32_0 : i32, i32, i32, i32
  }
  func.func @transform_1(%arg0: i32, %arg1: i32) -> (i32, i32, i32, i32) {
    %c2_i32 = arith.constant 2 : i32
    %0 = arith.addi %c2_i32, %arg0 : i32
    %c0_i32 = arith.constant 0 : i32
    %c0_i32_0 = arith.constant 0 : i32
    %c0_i32_1 = arith.constant 0 : i32
    return %0, %c0_i32, %arg1, %c0_i32_0 : i32, i32, i32, i32
  }
  func.func @transform_2(%arg0: i32, %arg1: i32) -> (i32, i32, i32, i32) {
    %c4_i32 = arith.constant 4 : i32
    %0 = arith.addi %c4_i32, %arg0 : i32
    %c0_i32 = arith.constant 0 : i32
    %c0_i32_0 = arith.constant 0 : i32
    %c0_i32_1 = arith.constant 0 : i32
    return %0, %c0_i32, %arg1, %c0_i32_0 : i32, i32, i32, i32
  }
  func.func @transform_3(%arg0: i32, %arg1: i32) -> (i32, i32, i32, i32) {
    %c0_i32 = arith.constant 0 : i32
    %c0_i32_0 = arith.constant 0 : i32
    %c0_i32_1 = arith.constant 0 : i32
    return %arg0, %c0_i32, %arg1, %c0_i32_0 : i32, i32, i32, i32
  }
}

module attributes {stable_mosaic.version = 11 : i64} {
  func.func @_matmul_bias_kernel(%arg0: i32, %arg1: i32, %arg2: i32, %arg3: memref<16x32xf32, #tpu.memory_space<vmem>>, %arg4: memref<32x32xf32, #tpu.memory_space<vmem>>, %arg5: memref<1x32xf32, #tpu.memory_space<vmem>>, %arg6: memref<16x32xf32, #tpu.memory_space<vmem>>, %arg7: memref<16x32xf32, #tpu.memory_space<vmem>>) attributes {dimension_semantics = [#tpu.dimension_semantics<parallel>, #tpu.dimension_semantics<parallel>, #tpu.dimension_semantics<arbitrary>], iteration_bounds = array<i64: 1, 1, 1>, scalar_prefetch = 0 : i64, scratch_operands = 1 : i64, tpu.core_type = #tpu.core_type<tc>, window_params = [{transform_indices = @transform_0, window_bounds = array<i64: 16, 32>}, {transform_indices = @transform_1, window_bounds = array<i64: 32, 32>}, {transform_indices = @transform_2, window_bounds = array<i64: 1, 32>}, {transform_indices = @transform_3, window_bounds = array<i64: 16, 32>}]} {
    %c0_i32 = arith.constant 0 : i32
    %0 = arith.cmpi eq, %arg2, %c0_i32 : i32
    %1 = arith.extui %0 : i1 to i32
    %c0_i32_0 = arith.constant 0 : i32
    %2 = arith.cmpi ne, %1, %c0_i32_0 : i32
    scf.if %2 {
      %cst_10 = arith.constant 0.000000e+00 : f32
      %12 = vector.broadcast %cst_10 : f32 to vector<16x32xf32>
      %c0_11 = arith.constant 0 : index
      %c0_12 = arith.constant 0 : index
      %13 = vector.load %arg7[%c0_11, %c0_12] : memref<16x32xf32, #tpu.memory_space<vmem>>, vector<16x32xf32>
      tpu.vector_store %arg7[%c0_11, %c0_12], %12 {strides = array<i32>} : memref<16x32xf32, #tpu.memory_space<vmem>>, vector<16x32xf32>,
    } else {
    }
    %c0 = arith.constant 0 : index
    %c0_1 = arith.constant 0 : index
    %3 = vector.load %arg7[%c0, %c0_1] : memref<16x32xf32, #tpu.memory_space<vmem>>, vector<16x32xf32>
    %c0_2 = arith.constant 0 : index
    %c0_3 = arith.constant 0 : index
    %4 = vector.load %arg3[%c0_2, %c0_3] : memref<16x32xf32, #tpu.memory_space<vmem>>, vector<16x32xf32>
    %c0_4 = arith.constant 0 : index
    %c0_5 = arith.constant 0 : index
    %5 = vector.load %arg4[%c0_4, %c0_5] : memref<32x32xf32, #tpu.memory_space<vmem>>, vector<32x32xf32>
    %cst = arith.constant dense<0.000000e+00> : vector<16x32xf32>
    %6 = tpu.matmul %4, %5, %cst {dimension_numbers = #tpu.dot_dimension_numbers<[1], [0], [0], [1], [0, 0, 1, 1], [], []>} : vector<16x32xf32>, vector<32x32xf32>, vector<16x32xf32> -> vector<16x32xf32>
    %7 = arith.addf %3, %6 : vector<16x32xf32>
    %c0_6 = arith.constant 0 : index
    %c0_7 = arith.constant 0 : index
    %8 = vector.load %arg7[%c0_6, %c0_7] : memref<16x32xf32, #tpu.memory_space<vmem>>, vector<16x32xf32>
    tpu.vector_store %arg7[%c0_6, %c0_7], %7 {strides = array<i32>} : memref<16x32xf32, #tpu.memory_space<vmem>>, vector<16x32xf32>,
    %c0_i32_8 = arith.constant 0 : i32
    %9 = arith.cmpi eq, %arg2, %c0_i32_8 : i32
    %10 = arith.extui %9 : i1 to i32
    %c0_i32_9 = arith.constant 0 : i32
    %11 = arith.cmpi ne, %10, %c0_i32_9 : i32
    scf.if %11 {
      %c0_10 = arith.constant 0 : index
      %c0_11 = arith.constant 0 : index
      %12 = vector.load %arg7[%c0_10, %c0_11] : memref<16x32xf32, #tpu.memory_space<vmem>>, vector<16x32xf32>
      %c0_12 = arith.constant 0 : index
      %c0_13 = arith.constant 0 : index
      %13 = vector.load %arg5[%c0_12, %c0_13] : memref<1x32xf32, #tpu.memory_space<vmem>>, vector<1x32xf32>
      %14 = vector.broadcast %13 : vector<1x32xf32> to vector<16x32xf32>
      %15 = arith.addf %12, %14 : vector<16x32xf32>
      %c0_14 = arith.constant 0 : index
      %c0_15 = arith.constant 0 : index
      %16 = vector.load %arg6[%c0_14, %c0_15] : memref<16x32xf32, #tpu.memory_space<vmem>>, vector<16x32xf32>
      tpu.vector_store %arg6[%c0_14, %c0_15], %15 {strides = array<i32>} : memref<16x32xf32, #tpu.memory_space<vmem>>, vector<16x32xf32>,
    } else {
    }
    return
  }
  func.func @transform_0(%arg0: i32, %arg1: i32, %arg2: i32) -> (i32, i32) {
    %c0_i32 = arith.constant 0 : i32
    return %arg0, %arg2 : i32, i32
  }
  func.func @transform_1(%arg0: i32, %arg1: i32, %arg2: i32) -> (i32, i32) {
    %c0_i32 = arith.constant 0 : i32
    return %arg2, %arg1 : i32, i32
  }
  func.func @transform_2(%arg0: i32, %arg1: i32, %arg2: i32) -> (i32, i32) {
    %c0_i32 = arith.constant 0 : i32
    %c0_i32_0 = arith.constant 0 : i32
    return %c0_i32, %arg1 : i32, i32
  }
  func.func @transform_3(%arg0: i32, %arg1: i32, %arg2: i32) -> (i32, i32) {
    %c0_i32 = arith.constant 0 : i32
    return %arg0, %arg1 : i32, i32
  }
}

</mosaic_0001>

<bundles_post_ra>
// kernel: self_attention_forward.3
= control target key start
LH: loop header
LB: loop body
LE: loop exit
PB: predicated region body
PF: predicated region fallthrough
CT: control target
= control target key end

     0   :  { %7 = vsyncpa [#allocation4], 0  ;;  %s778_s0 = inlined_call_operand.hbm [shape: f32[16,32], index: 0, kind: input, shape index: {}]   ;;  %s779_s1 = inlined_call_operand.hbm [shape: f32[3,32,32], index: 1, kind: input, shape index: {}]   ;;  %s780_s2 = inlined_call_operand.vmem [shape: f32[3,16,32], index: 2, kind: output, shape index: {}]  }
   0x1   :  { %8 = vsyncpa [#allocation6], 0 }
   0x2   :  { %10 = vsyncpa [#allocation6 + $0x1], 0  ;;  %s659_s9 = smov 0   ;;  %s661_s10 = smov 0  }
   0x3   :  { %s663_s11 = smov 0   ;;  %s665_s12 = smov 0  }
   0x4   :  { %s667_s13 = smov 0   ;;  %s669_s14 = smov 0  }
   0x5 LB: > { %s432_s15 = sadd.s32 4294967295, %s638_s14   ;;  %p94_p0 = scmp.ne.s32.totalorder %s622_s10, %s618_s9  ;;  %s638_s14 = sphi %s669_s14, %s16_s14   ;;  %s634_s13 = sphi %s667_s13, %s789_s13   ;;  %s630_s12 = sphi %s665_s12, %s788_s12   ;;  %s626_s11 = sphi %s663_s11, %s787_s11   ;;  %s622_s10 = sphi %s661_s10, %s786_s10   ;;  %s618_s9 = sphi %s659_s9, %s785_s9  }
   0x6   : > { %p689_p1 = scmp.eq.s32.totalorder %s432_s15, 0  ;;  %p434_p2 = scmp.ge.s32.totalorder %s638_s14, 1 }
   0x7   : > { %p135_p3 = scmp.lt.s32.totalorder %s638_s14, 4  ;;  %s150_s20 = sshll.u32 %s778_s0, 4  ;;  %s151_s20 = int_to_ptr.hbm [resolvable:$true] %s150_s20 }
   0x8   : > { %p697_p4 = por %p689_p1, %p94_p0  ;;  %s640_s22 = smov [#allocation3]  }
   0x9   : > { %p704_p5 = pnand %p434_p2, %p135_p3  ;;  %s152_s23 = sshll.u32 %s640_s22, 4  ;;  %s153_s23 = int_to_ptr.vmem [resolvable:$true] %s152_s23 }
   0xa   : > { %s641_s24 = smov 128   ;;  %s642_s25 = smov 8  }
   0xb   : > { %p461_p6 = pneg %p704_p5  ;;  %s42_s26 = sadd.s32 1, %s634_s13 }
   0xc   : > { %p44_p8 = scmp.ge.s32.totalorder %s42_s26, 3  ;;  %p88_p9 = scmp.ne.s32.totalorder %s626_s11, %s622_s10 }
   0xd   : > { %p462_p7 = pnand %p461_p6, %p689_p1  ;;  %p89_p10 = scmp.eq.s32.totalorder %s638_s14, 0 }
   0xe   : > { %s791_s26 = smov (%p44_p8, %s42_s26), 0  ;;  %s81_s27 = sadd.s32 1, %s626_s11 }
   0xf   : > { %464 = dma.hbm_to_vmem [thread:$0]  (!%p462_p7), %s151_s20, 256, %s153_s23, [#allocation4], %s641_s24, %s641_s24, %s642_s25  }
  0x10   : > { %p719_p11 = por %p89_p10, %p88_p9  ;;  %s74_s29 = ssub.s32 %s634_s13, %s791_s26 }
  0x11   : > { %s166_s30 = sand.u32 1, %s626_s11   ;;  %p79_p12 = scmp.eq.s32.totalorder %s74_s29, 0 }
  0x12   : > { %p470_p13 = scmp.lt.s32.totalorder %s638_s14, 3  ;;  %s437_s3 = sshll.u32 %s166_s30, 5 }
  0x13   : > { %s449_s4 = sshll.u32 %s634_s13, 5  ;;  %s170_s15 = scalar_lea.vmem [#allocation5], %s437_s3 }
  0x14   : > { %s729_s5 = scalar_select %p79_p12, %s626_s11, %s81_s27  }
  0x15   : > { %s178_s8 = scalar_lea.hbm %s779_s1, %s449_s4  ;;  %s181_s18 = sshll.u32 %s170_s15, 4  ;;  %s182_s18 = int_to_ptr.vmem [resolvable:$true] %s181_s18 }
  0x16   : > { %s179_s9 = sshll.u32 %s178_s8, 4  ;;  %p466_p0 = pnand %p470_p13, %p719_p11  ;;  %s180_s9 = int_to_ptr.hbm [resolvable:$true] %s179_s9 }
  0x17   : > { %s167_s19 = scalar_lea.sflag [#allocation6], %s166_s30  ;;  %193 = sbr.rel (%p704_p5) target bundleno = 179 (0xb3), region = 28 }
  0x18   : > { %468 = dma.hbm_to_vmem [thread:$0]  (!%p466_p0), %s180_s9, 512, %s182_s18, %s167_s19, %s641_s24, %s641_s24, %s642_s25  }
  0x1c   : > { %609 = dma.done.wait (%p689_p1), [#allocation4], 256  }
  0x1d   : > { %611 = vsyncadd (%p689_p1), [#allocation4], 4294967040  ;;  %s200_s20 = sand.u32 1, %s622_s10  }
  0x1e   : > { %s442_s22 = sshll.u32 %s200_s20, 5  ;;  %s201_s23 = scalar_lea.sflag [#allocation6], %s200_s20 }
  0x1f   : > { %s204_s27 = scalar_lea.vmem [#allocation5], %s442_s22 }
  0x20   : > { %613 = dma.done.wait (%p697_p4), %s201_s23, 512  }
  0x21   : > { %615 = vsyncadd (%p697_p4), %s201_s23, 4294966784  ;;  %vm252_vm0 = vcmask 261120   ;;  %v643_v0 = vmov 0.0   ;;  %v262_v1 = vld [vmem:[%s204_s27 + $0x18] sm:$0xff]  ;;  %v261_v2 = vld [vmem:[%s204_s27 + $0x10] sm:$0xff]  ;;  %p236_p1 = scmp.lt.s32.totalorder %s630_s12, 2 }
  0x22   : > { %253 = vst.msk [vmem:[#allocation2] sm:$0xff] %vm252_vm0, %v643_v0  ;;  %282 = vmatpush.msra.mxu0 %v262_v1  ;;  %451 = vmatpush.msra.mxu1 %v262_v1  ;;  %v260_v3 = vld [vmem:[%s204_s27 + $0x8] sm:$0xff]  ;;  %v259_v4 = vld [vmem:[%s204_s27] sm:$0xff]  ;;  %v257_v5 = vld [vmem:[#allocation3] sm:$0xff] }
  0x23   : > { %254 = vst.msk [vmem:[#allocation2 + $0x8] sm:$0xff] %vm252_vm0, %v643_v0  ;;  %v258_v6 = vld [vmem:[#allocation3 + $0x8] sm:$0xff]  ;;  %s793_s12 = smov (!%p236_p1, %s630_s12), 2 }
  0x24   : > { %283 = vmatpush.msra.mxu0 %v261_v2  ;;  %452 = vmatpush.msra.mxu1 %v261_v2  ;;  %s450_s16 = sshll.u32 %s793_s12, 4 }
  0x25   : > { %s246_s24 = scalar_lea.vmem %s780_s2, %s450_s16 }
  0x26   : > { %284 = vmatpush.msra.mxu0 %v260_v3  ;;  %453 = vmatpush.msra.mxu1 %v260_v3 }
  0x28   : > { %285 = vmatpush.msra.mxu0 %v259_v4  ;;  %454 = vmatpush.msra.mxu1 %v259_v4 }
  0x29   : > { %445 = vmatmul.msk.f32.vlgmr.msra.gmra.mxu0 %vm252_vm0, %v257_v5  ;;  %446 = vmatmul.msk.f32.vlgmr.msra.gmra.mxu1 %vm252_vm0, %v258_v6  ;;  %v255_v7 = vld [vmem:[#allocation2] sm:$0xff] }
  0x2a   : > { %v256_v8 = vld [vmem:[#allocation2 + $0x8] sm:$0xff] }
  0xa6   : > { %v287_v9 = vpop.f32.mrf.mxu0  ;;  %v290_v10 = vpop.f32.mrf.mxu1 }
  0xa7   : > { %v293_v11 = vadd.f32 %v287_v9, %v255_v7  ;;  %v294_v12 = vadd.f32 %v290_v10, %v256_v8 }
  0xa9   : > { %295 = vst.msk [vmem:[#allocation2] sm:$0xff] %vm252_vm0, %v293_v11 }
  0xaa   : > { %296 = vst.msk [vmem:[#allocation2 + $0x8] sm:$0xff] %vm252_vm0, %v294_v12 }
  0xb0   : > { %v300_v13 = vld [vmem:[#allocation2] sm:$0xff] }
  0xb1   : > { %302 = vst.msk [vmem:[%s246_s24] sm:$0xff] %vm252_vm0, %v300_v13  ;;  %v301_v14 = vld [vmem:[#allocation2 + $0x8] sm:$0xff] }
  0xb2   : > { %303 = vst.msk [vmem:[%s246_s24 + $0x8] sm:$0xff] %vm252_vm0, %v301_v14 }
  0xb3 PF: > { %s16_s14 = sadd.s32 1, %s638_s14   ;;  %s785_s9 = smov %s622_s10 }
  0xb4   : > { %p13_p2 = scmp.ge.s32.totalorder %s16_s14, 5   ;;  %s786_s10 = smov %s626_s11 }
  0xb5   : > { %s787_s11 = smov %s729_s5  ;;  %s788_s12 = smov %s634_s13 }
  0xb6   : > { %s789_s13 = smov %s791_s26  ;;  %15 = sbr.rel (!%p13_p2) target bundleno = 5 (0x5), region = 82 }
  0xbb   :  { %340 = vsyncpa [#allocation4], 1 }
  0xbc   :  { %342 = vsyncpa [#allocation4 + $0x1], 1 }
  0xbd   :  { %343 = vsyncpa [#allocation6], 1 }
  0xbe   :  { %345 = vsyncpa [#allocation6 + $0x1], 1 }

// kernel: self_attention_forward.5
= control target key start
LH: loop header
LB: loop body
LE: loop exit
PB: predicated region body
PF: predicated region fallthrough
CT: control target
= control target key end

     0   :  { %vm19_vm0 = vcmask 261120   ;;  %v132_v2 = vmov 0.0   ;;  %s188_s0 = inlined_call_operand.vmem [shape: f32[16,32], index: 0, kind: input, shape index: {}]   ;;  %s189_s1 = inlined_call_operand.vmem [shape: f32[32,32], index: 1, kind: input, shape index: {}]   ;;  %s190_s2 = inlined_call_operand.vmem [shape: f32[1,32], index: 2, kind: input, shape index: {}]   ;;  %s191_s3 = inlined_call_operand.hbm [shape: f32[16,32], index: 3, kind: output, shape index: {}]  }
   0x1   :  { %v29_v0 = vld [vmem:[%s189_s1 + $0x18] sm:$0xff]  ;;  %v28_v1 = vld [vmem:[%s189_s1 + $0x10] sm:$0xff]  ;;  %20 = vst.msk [vmem:[#allocation2] sm:$0xff] %vm19_vm0, %v132_v2  ;;  %v27_v3 = vld [vmem:[%s189_s1 + $0x8] sm:$0xff] }
   0x2   :  { %49 = vmatpush.msra.mxu0 %v29_v0  ;;  %97 = vmatpush.msra.mxu1 %v29_v0  ;;  %21 = vst.msk [vmem:[#allocation2 + $0x8] sm:$0xff] %vm19_vm0, %v132_v2 }
   0x3   :  { %8 = vsyncpa [#allocation4], 0  ;;  %v26_v4 = vld [vmem:[%s189_s1] sm:$0xff]  ;;  %v25_v6 = vld [vmem:[%s188_s0 + $0x8] sm:$0xff]  ;;  %s83_s28 = sshll.u32 %s191_s3, 4  ;;  %s134_s29 = smov 128   ;;  %s84_s28 = int_to_ptr.hbm [resolvable:$true] %s83_s28 }
   0x4   :  { %50 = vmatpush.msra.mxu0 %v28_v1  ;;  %98 = vmatpush.msra.mxu1 %v28_v1  ;;  %v24_v5 = vld [vmem:[%s188_s0] sm:$0xff]  ;;  %s133_s0 = smov [#allocation3]   ;;  %s135_s30 = smov 8  }
   0x5   :  { %v105_v13 = vld [vmem:[%s190_s2] ss:$0 sm:$0xff]  ;;  %s81_s25 = sshll.u32 %s133_s0, 4  ;;  %s82_s25 = int_to_ptr.vmem [resolvable:$true] %s81_s25 }
   0x6   :  { %51 = vmatpush.msra.mxu0 %v27_v3  ;;  %99 = vmatpush.msra.mxu1 %v27_v3 }
   0x8   :  { %52 = vmatpush.msra.mxu0 %v26_v4  ;;  %100 = vmatpush.msra.mxu1 %v26_v4  ;;  %v22_v7 = vld [vmem:[#allocation2] sm:$0xff] }
   0x9   :  { %95 = vmatmul.msk.f32.vlgmr.msra.gmra.mxu0 %vm19_vm0, %v24_v5  ;;  %96 = vmatmul.msk.f32.vlgmr.msra.gmra.mxu1 %vm19_vm0, %v25_v6  ;;  %v23_v8 = vld [vmem:[#allocation2 + $0x8] sm:$0xff] }
  0x86   :  { %v54_v9 = vpop.f32.mrf.mxu0  ;;  %v57_v10 = vpop.f32.mrf.mxu1 }
  0x87   :  { %v60_v11 = vadd.f32 %v54_v9, %v22_v7  ;;  %v61_v12 = vadd.f32 %v57_v10, %v23_v8 }
  0x89   :  { %62 = vst.msk [vmem:[#allocation2] sm:$0xff] %vm19_vm0, %v60_v11 }
  0x8a   :  { %63 = vst.msk [vmem:[#allocation2 + $0x8] sm:$0xff] %vm19_vm0, %v61_v12 }
  0x90   :  { %v67_v14 = vld [vmem:[#allocation2] sm:$0xff] }
  0x91   :  { %v68_v15 = vld [vmem:[#allocation2 + $0x8] sm:$0xff]  ;;  %v73_v16 = vadd.f32 %v105_v13, %v67_v14 }
  0x92   :  { %v74_v17 = vadd.f32 %v105_v13, %v68_v15 }
  0x93   :  { %75 = vst.msk [vmem:[#allocation3] sm:$0xff] %vm19_vm0, %v73_v16 }
  0x94   :  { %76 = vst.msk [vmem:[#allocation3 + $0x8] sm:$0xff] %vm19_vm0, %v74_v17 }
  0x95   :  { %89 = dma.vmem_to_hbm [thread:$0]  %s82_s25, 256, %s84_s28, [#allocation4], %s134_s29, %s134_s29, %s135_s30  }
  0x96   :  { %130 = dma.done.wait [#allocation4], 256  }
  0x97   :  { %131 = vsyncadd [#allocation4], 4294967040 }
  0x98   :  { %94 = vsyncpa [#allocation4], 1 }

// kernel: self_attention_forward.4
= control target key start
LH: loop header
LB: loop body
LE: loop exit
PB: predicated region body
PF: predicated region fallthrough
CT: control target
= control target key end

     0   :  { %s1396_s12 = smov 0   ;;  %s1398_s13 = smov 0   ;;  %s1871_s0 = inlined_call_operand.vmem [shape: f32[6,8,8,4], index: 0, kind: input, shape index: {}, may-alias: {0,1,2}]   ;;  %s1872_s1 = inlined_call_operand.vmem [shape: f32[6,8,8,4], index: 1, kind: input, shape index: {}, may-alias: {0,1,2}]   ;;  %s1873_s2 = inlined_call_operand.vmem [shape: f32[6,8,8,4], index: 2, kind: input, shape index: {}, may-alias: {0,1,2}]   ;;  %s1874_s3 = inlined_call_operand.vmem [shape: f32[2,8,8,4], index: 3, kind: output, shape index: {}]  }
   0x1   :  { %s1400_s14 = smov 0  }
   0x2 LB: > { %s25_s15 = sadd.s32 1, %s1362_s13  ;;  %p1241_p0 = scmp.ge.s32.totalorder %s1366_s14, 1  ;;  %s1366_s14 = sphi %s1400_s14, %s13_s14   ;;  %s1362_s13 = sphi %s1398_s13, %s1876_s13   ;;  %s1358_s12 = sphi %s1396_s12, %s1875_s12  }
   0x3   : > { %p27_p1 = scmp.ge.s32.totalorder %s25_s15, 2  ;;  %p194_p2 = scmp.lt.s32.totalorder %s1366_s14, 3 }
   0x5   : > { %s1878_s15 = smov (%p27_p1, %s25_s15), 0  ;;  %p195_p3 = pnand %p1241_p0, %p194_p2 }
   0x6   : > { %p242_p4 = scmp.lt.s32.totalorder (!%p195_p3), %s1358_s12, 5  ;;  %s250_s16 = sadd.s32 (!%p195_p3), 2, %s1358_s12 }
   0x7   : > { %198 = sbr.rel (%p195_p3) target bundleno = 858 (0x35a), region = 32  ;;  %p251_p5 = scmp.lt.s32.totalorder (!%p195_p3), %s250_s16, 5 }
   0x8   : > { %s260_s26 = sadd.s32 (!%p195_p3), 4, %s1358_s12  ;;  %p270_p7 = scmp.lt.s32.totalorder (!%p195_p3), %s1358_s12, 1 }
   0x9   : > { %p261_p6 = scmp.lt.s32.totalorder (!%p195_p3), %s260_s26, 5 }
   0xc   : > { %s243_s17 = scalar_select %p242_p4, %s1358_s12, 5  ;;  %vm318_vm0 = vcmask 31744   ;;  %vm567_vm1 = vcmask 7168   ;;  %vm576_vm2 = vcmask 15360   ;;  %vm585_vm3 = vcmask 23552  }
   0xd   : > { %s1880_s16 = smov (!%p251_p5, %s250_s16), 5  ;;  %vm602_vm4 = vcmask 39936   ;;  %vm611_vm5 = vcmask 48128   ;;  %vm620_vm6 = vcmask 56320   ;;  %vm629_vm7 = vcmask 64512   ;;  %s1882_s26 = smov (!%p261_p6, %s260_s26), 5 }
   0xe   : > { %s1252_s18 = sshll.u32 %s243_s17, 6  ;;  %s1253_s22 = sshll.u32 %s1880_s16, 6 }
   0xf   : > { %s249_s21 = scalar_lea.vmem %s1871_s0, %s1252_s18  ;;  %s1425_s25 = scalar_lea.vmem %s1872_s1, %s1253_s22 }
  0x10   : > { %v282_v0 = vld [vmem:[%s249_s21 + $0x20] sm:$0xff]  ;;  %v280_v1 = vld [vmem:[%s249_s21 + $0x10] sm:$0xff]  ;;  %v283_v7 = vld [vmem:[%s249_s21 + $0x28] sm:$0xff]  ;;  %s1254_s27 = sshll.u32 %s1882_s26, 6  ;;  %s1884_s12 = smov (!%p270_p7, %s1358_s12), 1 }
  0x11   : > { %v278_v2 = vld [vmem:[%s249_s21] sm:$0xff]  ;;  %v1427_v3 = vmul.f32 0.5, %v282_v0  ;;  %v1430_v5 = vmul.f32 0.5, %v280_v1  ;;  %v281_v8 = vld [vmem:[%s249_s21 + $0x18] sm:$0xff]  ;;  %v1434_v9 = vmul.f32 0.5, %v283_v7  ;;  %v279_v10 = vld [vmem:[%s249_s21 + $0x8] sm:$0xff]  ;;  %s1735_s30 = scalar_lea.vmem %s1873_s2, %s1254_s27 }
  0x12   : > { %v294_v4 = vld [vmem:[%s1425_s25] sm:$0xff]  ;;  %v1432_v6 = vmul.f32 0.5, %v278_v2  ;;  %v1439_v14 = vmul.f32 0.5, %v281_v8  ;;  %v1441_v15 = vmul.f32 0.5, %v279_v10  ;;  %v285_v22 = vld [vmem:[%s249_s21 + $0x38] sm:$0xff]  ;;  %v284_v23 = vld [vmem:[%s249_s21 + $0x30] sm:$0xff] }
  0x13   : > { %v314_v11 = vmul.f32 %v294_v4, %v1427_v3  ;;  %v312_v12 = vmul.f32 %v294_v4, %v1430_v5  ;;  %v315_v19 = vmul.f32 %v294_v4, %v1434_v9  ;;  %v1451_v26 = vmul.f32 0.5, %v285_v22  ;;  %v295_v28 = vld [vmem:[%s1425_s25 + $0x8] sm:$0xff]  ;;  %v296_v48 = vld [vmem:[%s1425_s25 + $0x10] sm:$0xff]  ;;  %v298_v22 = vld [vmem:[%s1425_s25 + $0x20] sm:$0xff]  ;;  %s1255_s4 = sshll.u32 %s1884_s12, 6 }
  0x14   : > { %v310_v13 = vmul.f32 %v294_v4, %v1432_v6  ;;  %v313_v20 = vmul.f32 %v294_v4, %v1439_v14  ;;  %v311_v21 = vmul.f32 %v294_v4, %v1441_v15  ;;  %v1455_v29 = vmul.f32 0.5, %v284_v23  ;;  %s1819_s7 = scalar_lea.vmem %s1874_s3, %s1255_s4 }
  0x15   : > { %v331_v16 = vsel %vm318_vm0, %v314_v11, 0.0  ;;  %v325_v17 = vsel %vm318_vm0, %v312_v12, 0.0  ;;  %v334_v24 = vsel %vm318_vm0, %v315_v19, 0.0  ;;  %v317_v30 = vmul.f32 %v294_v4, %v1451_v26 }
  0x16   : > { %v319_v18 = vsel %vm318_vm0, %v310_v13, 0.0  ;;  %332 = vadd.xlane.f32.xlu2 %v331_v16  ;;  %326 = vadd.xlane.f32.xlu1 %v325_v17  ;;  %v328_v25 = vsel %vm318_vm0, %v313_v20, 0.0  ;;  %v322_v27 = vsel %vm318_vm0, %v311_v21, 0.0  ;;  %v343_v31 = vmul.f32 %v295_v28, %v1432_v6 }
  0x17   : > { %320 = vadd.xlane.f32.xlu0 %v319_v18  ;;  %v316_v32 = vmul.f32 %v294_v4, %v1455_v29  ;;  %v340_v33 = vsel %vm318_vm0, %v317_v30, 0.0  ;;  %v345_v36 = vmul.f32 %v295_v28, %v1430_v5  ;;  %v346_v37 = vmul.f32 %v295_v28, %v1439_v14  ;;  %v297_v4 = vld [vmem:[%s1425_s25 + $0x18] sm:$0xff] }
  0x18   : > { %v351_v34 = vsel %vm318_vm0, %v343_v31, 0.0  ;;  %v344_v38 = vmul.f32 %v295_v28, %v1441_v15  ;;  %v348_v42 = vmul.f32 %v295_v28, %v1434_v9  ;;  %v349_v43 = vmul.f32 %v295_v28, %v1455_v29 }
  0x19   : > { %v337_v35 = vsel %vm318_vm0, %v316_v32, 0.0  ;;  %v357_v39 = vsel %vm318_vm0, %v345_v36, 0.0  ;;  %v360_v40 = vsel %vm318_vm0, %v346_v37, 0.0  ;;  %v347_v44 = vmul.f32 %v295_v28, %v1427_v3 }
  0x1a   : > { %v354_v41 = vsel %vm318_vm0, %v344_v38, 0.0  ;;  %v366_v45 = vsel %vm318_vm0, %v348_v42, 0.0  ;;  %v369_v46 = vsel %vm318_vm0, %v349_v43, 0.0  ;;  %v375_v49 = vmul.f32 %v296_v48, %v1432_v6  ;;  %v299_v43 = vld [vmem:[%s1425_s25 + $0x28] sm:$0xff] }
  0x1b   : > { %v363_v47 = vsel %vm318_vm0, %v347_v44, 0.0  ;;  %v376_v50 = vmul.f32 %v296_v48, %v1441_v15  ;;  %v350_v51 = vmul.f32 %v295_v28, %v1451_v26  ;;  %v378_v55 = vmul.f32 %v296_v48, %v1439_v14 }
  0x1c   : > { %v383_v52 = vsel %vm318_vm0, %v375_v49, 0.0  ;;  %v379_v56 = vmul.f32 %v296_v48, %v1427_v3  ;;  %v377_v57 = vmul.f32 %v296_v48, %v1430_v5  ;;  %v381_v61 = vmul.f32 %v296_v48, %v1455_v29 }
  0x1d   : > { %v386_v53 = vsel %vm318_vm0, %v376_v50, 0.0  ;;  %v372_v54 = vsel %vm318_vm0, %v350_v51, 0.0  ;;  %v392_v58 = vsel %vm318_vm0, %v378_v55, 0.0  ;;  %v382_v62 = vmul.f32 %v296_v48, %v1451_v26 }
  0x1e   : > { %335 = vadd.xlane.f32.xlu2 %v334_v24  ;;  %329 = vadd.xlane.f32.xlu1 %v328_v25  ;;  %v395_v59 = vsel %vm318_vm0, %v379_v56, 0.0  ;;  %v389_v60 = vsel %vm318_vm0, %v377_v57, 0.0  ;;  %v380_v63 = vmul.f32 %v296_v48, %v1434_v9  ;;  %v401_v0 = vsel %vm318_vm0, %v381_v61, 0.0 }
  0x1f   : > { %323 = vadd.xlane.f32.xlu0 %v322_v27  ;;  %v404_v1 = vsel %vm318_vm0, %v382_v62, 0.0  ;;  %v408_v7 = vmul.f32 %v297_v4, %v1441_v15  ;;  %v409_v8 = vmul.f32 %v297_v4, %v1430_v5  ;;  %v407_v10 = vmul.f32 %v297_v4, %v1432_v6 }
  0x20   : > { %v398_v2 = vsel %vm318_vm0, %v380_v63, 0.0  ;;  %v411_v16 = vmul.f32 %v297_v4, %v1427_v3  ;;  %v412_v17 = vmul.f32 %v297_v4, %v1434_v9  ;;  %v410_v18 = vmul.f32 %v297_v4, %v1439_v14 }
  0x21   : > { %v418_v11 = vsel %vm318_vm0, %v408_v7, 0.0  ;;  %v421_v12 = vsel %vm318_vm0, %v409_v8, 0.0  ;;  %v415_v13 = vsel %vm318_vm0, %v407_v10, 0.0  ;;  %v414_v23 = vmul.f32 %v297_v4, %v1451_v26 }
  0x22   : > { %v427_v19 = vsel %vm318_vm0, %v411_v16, 0.0  ;;  %v430_v20 = vsel %vm318_vm0, %v412_v17, 0.0  ;;  %v424_v21 = vsel %vm318_vm0, %v410_v18, 0.0  ;;  %v439_v24 = vmul.f32 %v298_v22, %v1432_v6 }
  0x23   : > { %v413_v25 = vmul.f32 %v297_v4, %v1455_v29  ;;  %v436_v27 = vsel %vm318_vm0, %v414_v23, 0.0  ;;  %v441_v31 = vmul.f32 %v298_v22, %v1430_v5  ;;  %v442_v32 = vmul.f32 %v298_v22, %v1439_v14 }
  0x24   : > { %v447_v28 = vsel %vm318_vm0, %v439_v24, 0.0  ;;  %v444_v37 = vmul.f32 %v298_v22, %v1434_v9  ;;  %v445_v38 = vmul.f32 %v298_v22, %v1455_v29  ;;  %v471_v44 = vmul.f32 %v299_v43, %v1432_v6 }
  0x25   : > { %v433_v30 = vsel %vm318_vm0, %v413_v25, 0.0  ;;  %v474_v50 = vmul.f32 %v299_v43, %v1439_v14  ;;  %v475_v51 = vmul.f32 %v299_v43, %v1427_v3  ;;  %v477_v56 = vmul.f32 %v299_v43, %v1455_v29 }
  0x26   : > { %341 = vadd.xlane.f32.xlu1 %v340_v33  ;;  %352 = vadd.xlane.f32.xlu2 %v351_v34  ;;  %v440_v33 = vmul.f32 %v298_v22, %v1441_v15  ;;  %v453_v34 = vsel %vm318_vm0, %v441_v31, 0.0  ;;  %v478_v57 = vmul.f32 %v299_v43, %v1451_v26 }
  0x27   : > { %338 = vadd.xlane.f32.xlu0 %v337_v35  ;;  %v456_v35 = vsel %vm318_vm0, %v442_v32, 0.0  ;;  %v497_v62 = vsel %vm318_vm0, %v477_v56, 0.0 }
  0x28   : > { %v450_v36 = vsel %vm318_vm0, %v440_v33, 0.0  ;;  %v500_v63 = vsel %vm318_vm0, %v478_v57, 0.0 }
  0x2e   : > { %358 = vadd.xlane.f32.xlu1 %v357_v39  ;;  %361 = vadd.xlane.f32.xlu2 %v360_v40  ;;  %v443_v39 = vmul.f32 %v298_v22, %v1427_v3  ;;  %v462_v40 = vsel %vm318_vm0, %v444_v37, 0.0 }
  0x2f   : > { %355 = vadd.xlane.f32.xlu0 %v354_v41  ;;  %v465_v41 = vsel %vm318_vm0, %v445_v38, 0.0 }
  0x30   : > { %v459_v42 = vsel %vm318_vm0, %v443_v39, 0.0 }
  0x36   : > { %367 = vadd.xlane.f32.xlu1 %v366_v45  ;;  %370 = vadd.xlane.f32.xlu2 %v369_v46  ;;  %v472_v45 = vmul.f32 %v299_v43, %v1441_v15  ;;  %v446_v46 = vmul.f32 %v298_v22, %v1451_v26 }
  0x37   : > { %364 = vadd.xlane.f32.xlu0 %v363_v47  ;;  %v479_v47 = vsel %vm318_vm0, %v471_v44, 0.0 }
  0x38   : > { %v482_v48 = vsel %vm318_vm0, %v472_v45, 0.0  ;;  %v468_v49 = vsel %vm318_vm0, %v446_v46, 0.0 }
  0x3e   : > { %384 = vadd.xlane.f32.xlu1 %v383_v52  ;;  %387 = vadd.xlane.f32.xlu2 %v386_v53  ;;  %v473_v52 = vmul.f32 %v299_v43, %v1430_v5  ;;  %v488_v53 = vsel %vm318_vm0, %v474_v50, 0.0 }
  0x3f   : > { %373 = vadd.xlane.f32.xlu0 %v372_v54  ;;  %v491_v54 = vsel %vm318_vm0, %v475_v51, 0.0 }
  0x40   : > { %v485_v55 = vsel %vm318_vm0, %v473_v52, 0.0 }
  0x46   : > { %393 = vadd.xlane.f32.xlu1 %v392_v58  ;;  %396 = vadd.xlane.f32.xlu2 %v395_v59  ;;  %v476_v58 = vmul.f32 %v299_v43, %v1434_v9 }
  0x47   : > { %390 = vadd.xlane.f32.xlu0 %v389_v60 }
  0x4e   : > { %402 = vadd.xlane.f32.xlu1 %v401_v0  ;;  %405 = vadd.xlane.f32.xlu2 %v404_v1  ;;  %v494_v0 = vsel %vm318_vm0, %v476_v58, 0.0  ;;  %v300_v1 = vld [vmem:[%s1425_s25 + $0x30] sm:$0xff] }
  0x4f   : > { %399 = vadd.xlane.f32.xlu0 %v398_v2  ;;  %v504_v2 = vmul.f32 %v300_v1, %v1441_v15  ;;  %v505_v4 = vmul.f32 %v300_v1, %v1430_v5  ;;  %v503_v7 = vmul.f32 %v300_v1, %v1432_v6  ;;  %v507_v17 = vmul.f32 %v300_v1, %v1427_v3 }
  0x50   : > { %v508_v18 = vmul.f32 %v300_v1, %v1434_v9  ;;  %v509_v32 = vmul.f32 %v300_v1, %v1455_v29 }
  0x51   : > { %v511_v16 = vsel %vm318_vm0, %v503_v7, 0.0  ;;  %v523_v24 = vsel %vm318_vm0, %v507_v17, 0.0 }
  0x52   : > { %v526_v25 = vsel %vm318_vm0, %v508_v18, 0.0  ;;  %v529_v39 = vsel %vm318_vm0, %v509_v32, 0.0 }
  0x56   : > { %419 = vadd.xlane.f32.xlu1 %v418_v11  ;;  %422 = vadd.xlane.f32.xlu2 %v421_v12  ;;  %v514_v12 = vsel %vm318_vm0, %v504_v2, 0.0 }
  0x57   : > { %416 = vadd.xlane.f32.xlu0 %v415_v13  ;;  %v517_v13 = vsel %vm318_vm0, %v505_v4, 0.0 }
  0x5e   : > { %428 = vadd.xlane.f32.xlu1 %v427_v19  ;;  %431 = vadd.xlane.f32.xlu2 %v430_v20  ;;  %v506_v19 = vmul.f32 %v300_v1, %v1439_v14 }
  0x5f   : > { %425 = vadd.xlane.f32.xlu0 %v424_v21 }
  0x66   : > { %437 = vadd.xlane.f32.xlu1 %v436_v27  ;;  %448 = vadd.xlane.f32.xlu2 %v447_v28  ;;  %v520_v27 = vsel %vm318_vm0, %v506_v19, 0.0  ;;  %v301_v28 = vld [vmem:[%s1425_s25 + $0x38] sm:$0xff] }
  0x67   : > { %434 = vadd.xlane.f32.xlu0 %v433_v30  ;;  %v510_v30 = vmul.f32 %v300_v1, %v1451_v26  ;;  %v535_v31 = vmul.f32 %v301_v28, %v1432_v6  ;;  %v538_v6 = vmul.f32 %v301_v28, %v1439_v14  ;;  %v541_v14 = vmul.f32 %v301_v28, %v1455_v29 }
  0x69   : > { %v532_v37 = vsel %vm318_vm0, %v510_v30, 0.0  ;;  %v543_v38 = vsel %vm318_vm0, %v535_v31, 0.0  ;;  %v561_v56 = vsel %vm318_vm0, %v541_v14, 0.0 }
  0x6e   : > { %454 = vadd.xlane.f32.xlu1 %v453_v34  ;;  %457 = vadd.xlane.f32.xlu2 %v456_v35 }
  0x6f   : > { %451 = vadd.xlane.f32.xlu0 %v450_v36 }
  0x76   : > { %463 = vadd.xlane.f32.xlu1 %v462_v40  ;;  %466 = vadd.xlane.f32.xlu2 %v465_v41  ;;  %v537_v40 = vmul.f32 %v301_v28, %v1430_v5  ;;  %v536_v41 = vmul.f32 %v301_v28, %v1441_v15  ;;  %v540_v5 = vmul.f32 %v301_v28, %v1434_v9 }
  0x77   : > { %460 = vadd.xlane.f32.xlu0 %v459_v42  ;;  %v539_v15 = vmul.f32 %v301_v28, %v1427_v3  ;;  %v542_v3 = vmul.f32 %v301_v28, %v1451_v26 }
  0x78   : > { %v549_v46 = vsel %vm318_vm0, %v537_v40, 0.0 }
  0x79   : > { %v555_v57 = vsel %vm318_vm0, %v539_v15, 0.0  ;;  %v564_v26 = vsel %vm318_vm0, %v542_v3, 0.0 }
  0x7e   : > { %480 = vadd.xlane.f32.xlu1 %v479_v47  ;;  %483 = vadd.xlane.f32.xlu2 %v482_v48  ;;  %v552_v47 = vsel %vm318_vm0, %v538_v6, 0.0  ;;  %v546_v48 = vsel %vm318_vm0, %v536_v41, 0.0 }
  0x7f   : > { %469 = vadd.xlane.f32.xlu0 %v468_v49 }
  0x86   : > { %489 = vadd.xlane.f32.xlu1 %v488_v53  ;;  %492 = vadd.xlane.f32.xlu2 %v491_v54 }
  0x87   : > { %486 = vadd.xlane.f32.xlu0 %v485_v55  ;;  %v558_v55 = vsel %vm318_vm0, %v540_v5, 0.0 }
  0x89   : > { %v1542_v59 = vpop.xlane.xlu2 %332  ;;  %v1544_v60 = vpop.xlane.xlu1 %326 }
  0x8a   : > { %v321_v61 = vpop.xlane.xlu0 %320 }
  0x8e   : > { %498 = vadd.xlane.f32.xlu1 %v497_v62  ;;  %501 = vadd.xlane.f32.xlu2 %v500_v63 }
  0x8f   : > { %495 = vadd.xlane.f32.xlu0 %v494_v0 }
  0x91   : > { %v1553_v8 = vpop.xlane.xlu2 %335  ;;  %v1555_v10 = vpop.xlane.xlu1 %329 }
  0x92   : > { %v324_v11 = vpop.xlane.xlu0 %323 }
  0x96   : > { %515 = vadd.xlane.f32.xlu1 %v514_v12  ;;  %518 = vadd.xlane.f32.xlu2 %v517_v13 }
  0x97   : > { %512 = vadd.xlane.f32.xlu0 %v511_v16 }
  0x99   : > { %v342_v20 = vpop.xlane.xlu1 %341  ;;  %v353_v21 = vpop.xlane.xlu2 %352 }
  0x9a   : > { %v568_v22 = vsel %vm567_vm1, %v321_v61, %v353_v21  ;;  %v339_v23 = vpop.xlane.xlu0 %338 }
  0x9e   : > { %524 = vadd.xlane.f32.xlu1 %v523_v24  ;;  %527 = vadd.xlane.f32.xlu2 %v526_v25 }
  0x9f   : > { %521 = vadd.xlane.f32.xlu0 %v520_v27 }
  0xa1   : > { %v359_v33 = vpop.xlane.xlu1 %358  ;;  %v362_v34 = vpop.xlane.xlu2 %361 }
  0xa2   : > { %v356_v35 = vpop.xlane.xlu0 %355  ;;  %v571_v9 = vsel %vm567_vm1, %v1555_v10, %v362_v34  ;;  %v570_v62 = vsel %vm567_vm1, %v1544_v60, %v359_v33 }
  0xa3   : > { %v569_v36 = vsel %vm567_vm1, %v324_v11, %v356_v35 }
  0xa6   : > { %533 = vadd.xlane.f32.xlu1 %v532_v37  ;;  %544 = vadd.xlane.f32.xlu2 %v543_v38 }
  0xa7   : > { %530 = vadd.xlane.f32.xlu0 %v529_v39 }
  0xa9   : > { %v368_v42 = vpop.xlane.xlu1 %367  ;;  %v371_v43 = vpop.xlane.xlu2 %370 }
  0xaa   : > { %v574_v44 = vsel %vm567_vm1, %v339_v23, %v371_v43  ;;  %v365_v45 = vpop.xlane.xlu0 %364 }
  0xab   : > { %v572_v29 = vsel %vm567_vm1, %v1542_v59, %v365_v45  ;;  %v573_v59 = vsel %vm567_vm1, %v1553_v8, %v368_v42 }
  0xae   : > { %550 = vadd.xlane.f32.xlu1 %v549_v46  ;;  %553 = vadd.xlane.f32.xlu2 %v552_v47 }
  0xaf   : > { %547 = vadd.xlane.f32.xlu0 %v546_v48 }
  0xb1   : > { %v385_v49 = vpop.xlane.xlu1 %384  ;;  %v388_v50 = vpop.xlane.xlu2 %387 }
  0xb2   : > { %v577_v51 = vsel %vm576_vm2, %v568_v22, %v385_v49  ;;  %v578_v52 = vsel %vm576_vm2, %v569_v36, %v388_v50  ;;  %v374_v53 = vpop.xlane.xlu0 %373 }
  0xb3   : > { %v575_v54 = vsel %vm567_vm1, %v342_v20, %v374_v53 }
  0xb6   : > { %559 = vadd.xlane.f32.xlu1 %v558_v55  ;;  %562 = vadd.xlane.f32.xlu2 %v561_v56 }
  0xb7   : > { %556 = vadd.xlane.f32.xlu0 %v555_v57 }
  0xb9   : > { %v394_v58 = vpop.xlane.xlu1 %393  ;;  %v397_v61 = vpop.xlane.xlu2 %396 }
  0xba   : > { %v580_v63 = vsel %vm576_vm2, %v571_v9, %v394_v58  ;;  %v581_v0 = vsel %vm576_vm2, %v572_v29, %v397_v61  ;;  %v391_v1 = vpop.xlane.xlu0 %390 }
  0xbb   : > { %v579_v2 = vsel %vm576_vm2, %v570_v62, %v391_v1 }
  0xbf   : > { %565 = vadd.xlane.f32.xlu0 %v564_v26 }
  0xc1   : > { %v403_v4 = vpop.xlane.xlu1 %402  ;;  %v406_v7 = vpop.xlane.xlu2 %405 }
  0xc2   : > { %v583_v10 = vsel %vm576_vm2, %v574_v44, %v403_v4  ;;  %v584_v11 = vsel %vm576_vm2, %v575_v54, %v406_v7  ;;  %v400_v60 = vpop.xlane.xlu0 %399 }
  0xc3   : > { %v582_v12 = vsel %vm576_vm2, %v573_v59, %v400_v60 }
  0xc9   : > { %v420_v13 = vpop.xlane.xlu1 %419  ;;  %v423_v16 = vpop.xlane.xlu2 %422 }
  0xca   : > { %v587_v17 = vsel %vm585_vm3, %v578_v52, %v420_v13  ;;  %v588_v18 = vsel %vm585_vm3, %v579_v2, %v423_v16  ;;  %v417_v19 = vpop.xlane.xlu0 %416 }
  0xcb   : > { %v586_v20 = vsel %vm585_vm3, %v577_v51, %v417_v19 }
  0xd1   : > { %v429_v21 = vpop.xlane.xlu1 %428  ;;  %v432_v22 = vpop.xlane.xlu2 %431 }
  0xd2   : > { %v1611_v8 = vsel %vm585_vm3, %v581_v0, %v429_v21  ;;  %v1614_v23 = vsel %vm585_vm3, %v582_v12, %v432_v22  ;;  %v426_v24 = vpop.xlane.xlu0 %425 }
  0xd3   : > { %v589_v25 = vsel %vm585_vm3, %v580_v63, %v426_v24 }
  0xd9   : > { %v438_v27 = vpop.xlane.xlu1 %437  ;;  %v449_v28 = vpop.xlane.xlu2 %448 }
  0xda   : > { %v1618_v30 = vsel %vm585_vm3, %v584_v11, %v438_v27  ;;  %v435_v31 = vpop.xlane.xlu0 %434  ;;  %v594_v50 = vsel %vm318_vm0, %v586_v20, %v449_v28 }
  0xdb   : > { %v592_v32 = vsel %vm585_vm3, %v583_v10, %v435_v31 }
  0xe1   : > { %v455_v33 = vpop.xlane.xlu1 %454  ;;  %v458_v34 = vpop.xlane.xlu2 %457 }
  0xe2   : > { %v452_v35 = vpop.xlane.xlu0 %451  ;;  %v596_v3 = vsel %vm318_vm0, %v588_v18, %v455_v33  ;;  %v597_v9 = vsel %vm318_vm0, %v589_v25, %v458_v34 }
  0xe3   : > { %v595_v29 = vsel %vm318_vm0, %v587_v17, %v452_v35 }
  0xe9   : > { %v464_v36 = vpop.xlane.xlu1 %463  ;;  %v467_v37 = vpop.xlane.xlu2 %466 }
  0xea   : > { %v461_v38 = vpop.xlane.xlu0 %460  ;;  %v599_v13 = vsel %vm318_vm0, %v1614_v23, %v464_v36  ;;  %v600_v16 = vsel %vm318_vm0, %v592_v32, %v467_v37 }
  0xeb   : > { %v598_v17 = vsel %vm318_vm0, %v1611_v8, %v461_v38 }
  0xf1   : > { %v481_v39 = vpop.xlane.xlu1 %480  ;;  %v484_v40 = vpop.xlane.xlu2 %483 }
  0xf2   : > { %v1621_v6 = vpop.xlane.xlu0 %469  ;;  %v603_v51 = vsel %vm602_vm4, %v594_v50, %v481_v39  ;;  %v604_v62 = vsel %vm602_vm4, %v595_v29, %v484_v40 }
  0xf3   : > { %v601_v35 = vsel %vm318_vm0, %v1618_v30, %v1621_v6 }
  0xf9   : > { %v490_v41 = vpop.xlane.xlu1 %489  ;;  %v493_v42 = vpop.xlane.xlu2 %492 }
  0xfa   : > { %v487_v43 = vpop.xlane.xlu0 %486  ;;  %v606_v58 = vsel %vm602_vm4, %v597_v9, %v490_v41  ;;  %v607_v20 = vsel %vm602_vm4, %v598_v17, %v493_v42 }
  0xfb   : > { %v605_v61 = vsel %vm602_vm4, %v596_v3, %v487_v43 }
 0x101   : > { %v499_v44 = vpop.xlane.xlu1 %498  ;;  %v1623_v45 = vpop.xlane.xlu2 %501 }
 0x102   : > { %v496_v46 = vpop.xlane.xlu0 %495  ;;  %v609_v18 = vsel %vm602_vm4, %v600_v16, %v499_v44  ;;  %v610_v36 = vsel %vm602_vm4, %v601_v35, %v1623_v45 }
 0x103   : > { %v608_v19 = vsel %vm602_vm4, %v599_v13, %v496_v46  ;;  %v1368_v13 = vmov 0  }
 0x104   : > { %1288 = vset.pattern.permute.xlu2 %v1368_v13  ;;  %1290 = vset.pattern.permute.xlu1 %v1368_v13 }
 0x105   : > { %1289 = vset.pattern.permute.xlu0 %v1368_v13 }
 0x109   : > { %v516_v47 = vpop.xlane.xlu1 %515  ;;  %v519_v48 = vpop.xlane.xlu2 %518 }
 0x10a   : > { %v513_v5 = vpop.xlane.xlu0 %512  ;;  %v614_v63 = vsel %vm611_vm5, %v605_v61, %v519_v48  ;;  %v613_v26 = vsel %vm611_vm5, %v604_v62, %v516_v47 }
 0x10b   : > { %v612_v52 = vsel %vm611_vm5, %v603_v51, %v513_v5 }
 0x111   : > { %v525_v14 = vpop.xlane.xlu1 %524  ;;  %v528_v15 = vpop.xlane.xlu2 %527 }
 0x112   : > { %v522_v49 = vpop.xlane.xlu0 %521  ;;  %v617_v21 = vsel %vm611_vm5, %v608_v19, %v528_v15  ;;  %v616_v27 = vsel %vm611_vm5, %v607_v20, %v525_v14 }
 0x113   : > { %v615_v0 = vsel %vm611_vm5, %v606_v58, %v522_v49 }
 0x119   : > { %v534_v53 = vpop.xlane.xlu1 %533  ;;  %v545_v54 = vpop.xlane.xlu2 %544 }
 0x11a   : > { %v531_v55 = vpop.xlane.xlu0 %530  ;;  %v621_v56 = vsel %vm620_vm6, %v612_v52, %v545_v54  ;;  %v619_v37 = vsel %vm611_vm5, %v610_v36, %v534_v53 }
 0x11b   : > { %v630_v57 = vsel %vm629_vm7, %v621_v56, -inf  ;;  %v618_v22 = vsel %vm611_vm5, %v609_v18, %v531_v55 }
 0x11c   : > { %631 = vmax.xlane.f32.xlu1 %v630_v57 }
 0x121   : > { %v551_v1 = vpop.xlane.xlu1 %550  ;;  %v554_v2 = vpop.xlane.xlu2 %553 }
 0x122   : > { %v548_v4 = vpop.xlane.xlu0 %547  ;;  %v623_v7 = vsel %vm620_vm6, %v614_v63, %v551_v1  ;;  %v624_v59 = vsel %vm620_vm6, %v615_v0, %v554_v2 }
 0x123   : > { %v636_v10 = vsel %vm629_vm7, %v623_v7, -inf  ;;  %v639_v11 = vsel %vm629_vm7, %v624_v59, -inf  ;;  %v622_v60 = vsel %vm620_vm6, %v613_v26, %v548_v4 }
 0x124   : > { %637 = vmax.xlane.f32.xlu0 %v636_v10  ;;  %640 = vmax.xlane.f32.xlu1 %v639_v11  ;;  %v633_v12 = vsel %vm629_vm7, %v622_v60, -inf }
 0x125   : > { %634 = vmax.xlane.f32.xlu2 %v633_v12 }
 0x129   : > { %v560_v24 = vpop.xlane.xlu1 %559  ;;  %v563_v25 = vpop.xlane.xlu2 %562 }
 0x12a   : > { %v557_v23 = vpop.xlane.xlu0 %556  ;;  %v626_v28 = vsel %vm620_vm6, %v617_v21, %v560_v24  ;;  %v627_v31 = vsel %vm620_vm6, %v618_v22, %v563_v25 }
 0x12b   : > { %v645_v8 = vsel %vm629_vm7, %v626_v28, -inf  ;;  %v648_v32 = vsel %vm629_vm7, %v627_v31, -inf  ;;  %v625_v33 = vsel %vm620_vm6, %v616_v27, %v557_v23 }
 0x12c   : > { %646 = vmax.xlane.f32.xlu0 %v645_v8  ;;  %649 = vmax.xlane.f32.xlu1 %v648_v32  ;;  %v642_v34 = vsel %vm629_vm7, %v625_v33, -inf }
 0x12d   : > { %643 = vmax.xlane.f32.xlu2 %v642_v34 }
 0x132   : > { %v566_v38 = vpop.xlane.xlu0 %565 }
 0x133   : > { %v628_v39 = vsel %vm620_vm6, %v619_v37, %v566_v38  ;;  %v1369_v38 = vmov 1  }
 0x134   : > { %v651_v40 = vsel %vm629_vm7, %v628_v39, -inf }
 0x135   : > { %652 = vmax.xlane.f32.xlu2 %v651_v40 }
 0x18f   : > { %v632_v41 = vpop.xlane.xlu1 %631 }
 0x190   : > { %v654_v42 = vsub.f32 %v621_v56, %v632_v41 }
 0x192   : > { %v662_v43 = vmul.f32 1.442695, %v654_v42 }
 0x194   : > { %1312 = vpow2.f32 %v662_v43  ;;  %v1370_v43 = vmov 2  }
 0x197   : > { %v641_v44 = vpop.xlane.xlu1 %640  ;;  %v638_v46 = vpop.xlane.xlu0 %637 }
 0x198   : > { %v657_v47 = vsub.f32 %v624_v59, %v641_v44  ;;  %v635_v48 = vpop.xlane.xlu2 %634  ;;  %v656_v30 = vsub.f32 %v623_v7, %v638_v46  ;;  %v1371_v44 = vmov 3   ;;  %v1372_v46 = vmov 4  }
 0x199   : > { %v655_v6 = vsub.f32 %v622_v60, %v635_v48 }
 0x19a   : > { %v1313_v5 = vpop.eup %1312  ;;  %v668_v45 = vmul.f32 1.442695, %v657_v47  ;;  %v666_v14 = vmul.f32 1.442695, %v656_v30  ;;  %v1373_v47 = vmov 5  }
 0x19b   : > { %v664_v15 = vmul.f32 1.442695, %v655_v6  ;;  %v678_v49 = vsel %vm629_vm7, %v1313_v5, 0.0  ;;  %v1374_v6 = vmov 6  }
 0x19c   : > { %1314 = vpow2.f32 %v668_v45  ;;  %679 = vadd.xlane.f32.xlu0 %v678_v49  ;;  %v1375_v49 = vmov 7  }
 0x19d   : > { %1316 = vpow2.f32 %v664_v15 }
 0x19e   : > { %1318 = vpow2.f32 %v666_v14 }
 0x19f   : > { %v650_v50 = vpop.xlane.xlu1 %649  ;;  %v647_v51 = vpop.xlane.xlu0 %646 }
 0x1a0   : > { %v660_v52 = vsub.f32 %v627_v31, %v650_v50  ;;  %v644_v53 = vpop.xlane.xlu2 %643  ;;  %v659_v54 = vsub.f32 %v626_v28, %v647_v51  ;;  %v303_v51 = vld [vmem:[%s1735_s30 + $0x8] sm:$0xff] }
 0x1a1   : > { %v658_v55 = vsub.f32 %v625_v33, %v644_v53 }
 0x1a2   : > { %v1315_v56 = vpop.eup %1314  ;;  %v674_v57 = vmul.f32 1.442695, %v660_v52  ;;  %v672_v3 = vmul.f32 1.442695, %v659_v54 }
 0x1a3   : > { %v1317_v9 = vpop.eup %1316  ;;  %v670_v29 = vmul.f32 1.442695, %v658_v55  ;;  %v687_v58 = vsel %vm629_vm7, %v1315_v56, 0.0 }
 0x1a4   : > { %v1319_v61 = vpop.eup %1318  ;;  %1320 = vpow2.f32 %v674_v57  ;;  %688 = vadd.xlane.f32.xlu0 %v687_v58  ;;  %v681_v62 = vsel %vm629_vm7, %v1317_v9, 0.0 }
 0x1a5   : > { %1322 = vpow2.f32 %v670_v29  ;;  %682 = vadd.xlane.f32.xlu1 %v681_v62  ;;  %v684_v63 = vsel %vm629_vm7, %v1319_v61, 0.0 }
 0x1a6   : > { %1324 = vpow2.f32 %v672_v3  ;;  %685 = vadd.xlane.f32.xlu2 %v684_v63 }
 0x1a8   : > { %v653_v0 = vpop.xlane.xlu2 %652 }
 0x1a9   : > { %v661_v1 = vsub.f32 %v628_v39, %v653_v0 }
 0x1aa   : > { %v1321_v2 = vpop.eup %1320 }
 0x1ab   : > { %v1323_v26 = vpop.eup %1322  ;;  %v676_v4 = vmul.f32 1.442695, %v661_v1  ;;  %v696_v7 = vsel %vm629_vm7, %v1321_v2, 0.0 }
 0x1ac   : > { %v1325_v59 = vpop.eup %1324  ;;  %697 = vadd.xlane.f32.xlu0 %v696_v7  ;;  %v690_v10 = vsel %vm629_vm7, %v1323_v26, 0.0 }
 0x1ad   : > { %1326 = vpow2.f32 %v676_v4  ;;  %691 = vadd.xlane.f32.xlu1 %v690_v10  ;;  %v693_v11 = vsel %vm629_vm7, %v1325_v59, 0.0 }
 0x1ae   : > { %694 = vadd.xlane.f32.xlu2 %v693_v11 }
 0x1b3   : > { %v1327_v60 = vpop.eup %1326 }
 0x1b4   : > { %v699_v12 = vsel %vm629_vm7, %v1327_v60, 0.0 }
 0x1b5   : > { %700 = vadd.xlane.f32.xlu1 %v699_v12 }
 0x20f   : > { %v680_v16 = vpop.xlane.xlu0 %679 }
 0x210   : > { %1328 = vrcp.f32 %v680_v16  ;;  %v304_v16 = vld [vmem:[%s1735_s30 + $0x10] sm:$0xff] }
 0x216   : > { %v1329_v17 = vpop.eup %1328 }
 0x217   : > { %v1678_v18 = vmul.f32 %v1329_v17, %v1313_v5  ;;  %v689_v19 = vpop.xlane.xlu0 %688  ;;  %v302_v5 = vld [vmem:[%s1735_s30] sm:$0xff] }
 0x218   : > { %v683_v20 = vpop.xlane.xlu1 %682  ;;  %1330 = vrcp.f32 %v689_v19 }
 0x219   : > { %1332 = vrcp.f32 %v683_v20  ;;  %v686_v21 = vpop.xlane.xlu2 %685  ;;  %720 = vperm.xlu2 %1288, %v1678_v18  }
 0x21a   : > { %1334 = vrcp.f32 %v686_v21 }
 0x21e   : > { %v1331_v22 = vpop.eup %1330 }
 0x21f   : > { %v1333_v24 = vpop.eup %1332  ;;  %v1681_v25 = vmul.f32 %v1331_v22, %v1315_v56  ;;  %v698_v32 = vpop.xlane.xlu0 %697 }
 0x220   : > { %v1335_v27 = vpop.eup %1334  ;;  %v1683_v23 = vmul.f32 %v1333_v24, %v1317_v9  ;;  %v692_v28 = vpop.xlane.xlu1 %691 }
 0x221   : > { %v1685_v31 = vmul.f32 %v1335_v27, %v1319_v61  ;;  %1336 = vrcp.f32 %v692_v28  ;;  %v695_v8 = vpop.xlane.xlu2 %694  ;;  %735 = vperm.xlu2 %1288, %v1681_v25  }
 0x222   : > { %1338 = vrcp.f32 %v695_v8  ;;  %725 = vperm.xlu0 %1289, %v1683_v23  }
 0x223   : > { %730 = vperm.xlu1 %1290, %v1685_v31   ;;  %1340 = vrcp.f32 %v698_v32 }
 0x227   : > { %v1337_v33 = vpop.eup %1336 }
 0x228   : > { %v1339_v34 = vpop.eup %1338  ;;  %v1690_v35 = vmul.f32 %v1337_v33, %v1323_v26  ;;  %v701_v36 = vpop.xlane.xlu1 %700 }
 0x229   : > { %v1692_v37 = vmul.f32 %v1339_v34, %v1325_v59  ;;  %1342 = vrcp.f32 %v701_v36  ;;  %v1341_v39 = vpop.eup %1340 }
 0x22a   : > { %1291 = vset.pattern.permute.xlu0 %v1369_v38  ;;  %740 = vperm.xlu2 %1288, %v1690_v35   ;;  %v1697_v41 = vmul.f32 %v1341_v39, %v1321_v2 }
 0x22b   : > { %745 = vperm.xlu1 %1290, %v1692_v37   ;;  %775 = vperm.xlu0 %1291, %v1678_v18  }
 0x22f   : > { %v1343_v40 = vpop.eup %1342 }
 0x230   : > { %v1699_v42 = vmul.f32 %v1343_v40, %v1327_v60 }
 0x232   : > { %750 = vperm.xlu2 %1288, %v1697_v41  }
 0x233   : > { %755 = vperm.xlu1 %1290, %v1699_v42   ;;  %795 = vperm.xlu0 %1291, %v1692_v37  }
 0x23a   : > { %1292 = vset.pattern.permute.xlu2 %v1369_v38 }
 0x23b   : > { %1293 = vset.pattern.permute.xlu1 %v1369_v38  ;;  %1294 = vset.pattern.permute.xlu0 %v1370_v43 }
 0x23c   : > { %783 = vperm.xlu1 %1293, %v1685_v31   ;;  %779 = vperm.xlu2 %1292, %v1683_v23  }
 0x23d   : > { %823 = vperm.xlu0 %1294, %v1678_v18  }
 0x244   : > { %791 = vperm.xlu1 %1293, %v1690_v35   ;;  %787 = vperm.xlu2 %1292, %v1681_v25  }
 0x245   : > { %843 = vperm.xlu0 %1294, %v1692_v37  }
 0x24c   : > { %803 = vperm.xlu1 %1293, %v1699_v42   ;;  %799 = vperm.xlu2 %1292, %v1697_v41  }
 0x24d   : > { %1297 = vset.pattern.permute.xlu0 %v1371_v44 }
 0x24e   : > { %871 = vperm.xlu0 %1297, %v1678_v18  }
 0x254   : > { %1296 = vset.pattern.permute.xlu1 %v1370_v43  ;;  %1295 = vset.pattern.permute.xlu2 %v1370_v43 }
 0x255   : > { %831 = vperm.xlu1 %1296, %v1685_v31   ;;  %827 = vperm.xlu2 %1295, %v1683_v23  }
 0x256   : > { %891 = vperm.xlu0 %1297, %v1692_v37  }
 0x25d   : > { %839 = vperm.xlu1 %1296, %v1690_v35   ;;  %835 = vperm.xlu2 %1295, %v1681_v25  }
 0x25e   : > { %1300 = vset.pattern.permute.xlu0 %v1372_v46 }
 0x25f   : > { %919 = vperm.xlu0 %1300, %v1678_v18  }
 0x265   : > { %851 = vperm.xlu1 %1296, %v1699_v42   ;;  %847 = vperm.xlu2 %1295, %v1697_v41  }
 0x267   : > { %939 = vperm.xlu0 %1300, %v1692_v37  }
 0x26d   : > { %1299 = vset.pattern.permute.xlu1 %v1371_v44  ;;  %1298 = vset.pattern.permute.xlu2 %v1371_v44 }
 0x26e   : > { %879 = vperm.xlu1 %1299, %v1685_v31   ;;  %875 = vperm.xlu2 %1298, %v1683_v23  }
 0x26f   : > { %1303 = vset.pattern.permute.xlu0 %v1373_v47 }
 0x270   : > { %967 = vperm.xlu0 %1303, %v1678_v18  }
 0x273   : > { %v721_v48 = vpop.permute.xlu2 %720 }
 0x274   : > { %v758_v29 = vmul.f32 %v721_v48, %v302_v5 }
 0x276   : > { %887 = vperm.xlu1 %1299, %v1690_v35   ;;  %883 = vperm.xlu2 %1298, %v1681_v25  }
 0x278   : > { %987 = vperm.xlu0 %1303, %v1692_v37  }
 0x27b   : > { %v736_v30 = vpop.permute.xlu2 %735 }
 0x27c   : > { %v761_v62 = vmul.f32 %v736_v30, %v302_v5 }
 0x27e   : > { %899 = vperm.xlu1 %1299, %v1699_v42   ;;  %895 = vperm.xlu2 %1298, %v1697_v41  }
 0x280   : > { %1306 = vset.pattern.permute.xlu0 %v1374_v6 }
 0x281   : > { %1015 = vperm.xlu0 %1306, %v1678_v18  }
 0x284   : > { %v741_v45 = vpop.permute.xlu2 %740 }
 0x285   : > { %v1739_v14 = vmul.f32 %v741_v45, %v302_v5  ;;  %v1771_v45 = vld [vmem:[%s1735_s30 + $0x18] sm:$0xff] }
 0x286   : > { %1302 = vset.pattern.permute.xlu1 %v1372_v46  ;;  %1301 = vset.pattern.permute.xlu2 %v1372_v46 }
 0x287   : > { %927 = vperm.xlu1 %1302, %v1685_v31   ;;  %923 = vperm.xlu2 %1301, %v1683_v23  }
 0x289   : > { %1035 = vperm.xlu0 %1306, %v1692_v37  }
 0x28c   : > { %v751_v15 = vpop.permute.xlu2 %750 }
 0x28d   : > { %v764_v11 = vmul.f32 %v751_v15, %v302_v5 }
 0x28f   : > { %935 = vperm.xlu1 %1302, %v1690_v35   ;;  %931 = vperm.xlu2 %1301, %v1681_v25  }
 0x291   : > { %1309 = vset.pattern.permute.xlu0 %v1375_v49 }
 0x292   : > { %1063 = vperm.xlu0 %1309, %v1678_v18  }
 0x294   : > { %v726_v50 = vpop.permute.xlu0 %725 }
 0x295   : > { %v731_v52 = vpop.permute.xlu1 %730  ;;  %v759_v53 = vmul.f32 %v726_v50, %v302_v5 }
 0x296   : > { %v760_v54 = vmul.f32 %v731_v52, %v302_v5  ;;  %v780_v55 = vpop.permute.xlu2 %779 }
 0x297   : > { %v807_v56 = vmul.f32 %v780_v55, %v303_v51  ;;  %947 = vperm.xlu1 %1302, %v1699_v42   ;;  %943 = vperm.xlu2 %1301, %v1697_v41  }
 0x299   : > { %v815_v57 = vadd.f32 %v807_v56, %v759_v53 }
 0x29a   : > { %1083 = vperm.xlu0 %1309, %v1692_v37  }
 0x29d   : > { %v746_v3 = vpop.permute.xlu1 %745  ;;  %v776_v9 = vpop.permute.xlu0 %775 }
 0x29e   : > { %v788_v58 = vpop.permute.xlu2 %787  ;;  %v806_v61 = vmul.f32 %v776_v9, %v303_v51  ;;  %v763_v4 = vmul.f32 %v746_v3, %v302_v5 }
 0x29f   : > { %v809_v63 = vmul.f32 %v788_v58, %v303_v51  ;;  %1305 = vset.pattern.permute.xlu1 %v1373_v47  ;;  %1304 = vset.pattern.permute.xlu2 %v1373_v47 }
 0x2a0   : > { %v814_v0 = vadd.f32 %v806_v61, %v758_v29  ;;  %975 = vperm.xlu1 %1305, %v1685_v31   ;;  %971 = vperm.xlu2 %1304, %v1683_v23  }
 0x2a1   : > { %v817_v1 = vadd.f32 %v809_v63, %v761_v62 }
 0x2a5   : > { %v756_v2 = vpop.permute.xlu1 %755  ;;  %v796_v26 = vpop.permute.xlu0 %795 }
 0x2a6   : > { %v765_v7 = vmul.f32 %v756_v2, %v302_v5  ;;  %v800_v59 = vpop.permute.xlu2 %799  ;;  %v811_v10 = vmul.f32 %v796_v26, %v303_v51  ;;  %v306_v26 = vld [vmem:[%s1735_s30 + $0x20] sm:$0xff] }
 0x2a7   : > { %v812_v60 = vmul.f32 %v800_v59, %v303_v51 }
 0x2a8   : > { %v819_v12 = vadd.f32 %v811_v10, %v763_v4  ;;  %983 = vperm.xlu1 %1305, %v1690_v35   ;;  %979 = vperm.xlu2 %1304, %v1681_v25  }
 0x2a9   : > { %v820_v13 = vadd.f32 %v812_v60, %v764_v11 }
 0x2ae   : > { %v784_v17 = vpop.permute.xlu1 %783 }
 0x2af   : > { %v808_v18 = vmul.f32 %v784_v17, %v303_v51  ;;  %v828_v19 = vpop.permute.xlu2 %827  ;;  %v824_v20 = vpop.permute.xlu0 %823 }
 0x2b0   : > { %v855_v21 = vmul.f32 %v828_v19, %v304_v16  ;;  %v854_v22 = vmul.f32 %v824_v20, %v304_v16  ;;  %995 = vperm.xlu1 %1305, %v1699_v42   ;;  %991 = vperm.xlu2 %1304, %v1697_v41  }
 0x2b1   : > { %v816_v24 = vadd.f32 %v808_v18, %v760_v54 }
 0x2b2   : > { %v863_v27 = vadd.f32 %v855_v21, %v815_v57  ;;  %v1759_v28 = vadd.f32 %v854_v22, %v814_v0 }
 0x2b6   : > { %v792_v8 = vpop.permute.xlu1 %791 }
 0x2b7   : > { %v810_v32 = vmul.f32 %v792_v8, %v303_v51  ;;  %v836_v33 = vpop.permute.xlu2 %835  ;;  %v844_v34 = vpop.permute.xlu0 %843 }
 0x2b8   : > { %v857_v36 = vmul.f32 %v836_v33, %v304_v16  ;;  %v859_v37 = vmul.f32 %v844_v34, %v304_v16  ;;  %1308 = vset.pattern.permute.xlu1 %v1374_v6  ;;  %1307 = vset.pattern.permute.xlu2 %v1374_v6  ;;  %v1801_v33 = vld [vmem:[%s1735_s30 + $0x28] sm:$0xff] }
 0x2b9   : > { %v818_v38 = vadd.f32 %v810_v32, %v1739_v14  ;;  %1023 = vperm.xlu1 %1308, %v1685_v31   ;;  %1019 = vperm.xlu2 %1307, %v1683_v23  }
 0x2ba   : > { %v865_v39 = vadd.f32 %v857_v36, %v817_v1  ;;  %v1766_v40 = vadd.f32 %v859_v37, %v819_v12  ;;  %v1804_v37 = vld [vmem:[%s1735_s30 + $0x30] sm:$0xff] }
 0x2be   : > { %v804_v43 = vpop.permute.xlu1 %803 }
 0x2bf   : > { %v813_v44 = vmul.f32 %v804_v43, %v303_v51  ;;  %v848_v46 = vpop.permute.xlu2 %847 }
 0x2c0   : > { %v860_v47 = vmul.f32 %v848_v46, %v304_v16  ;;  %v872_v48 = vpop.permute.xlu0 %871 }
 0x2c1   : > { %v821_v30 = vadd.f32 %v813_v44, %v765_v7  ;;  %1031 = vperm.xlu1 %1308, %v1690_v35   ;;  %1027 = vperm.xlu2 %1307, %v1681_v25   ;;  %v902_v8 = vmul.f32 %v872_v48, %v1771_v45  ;;  %v1811_v48 = vld [vmem:[%s1735_s30 + $0x38] sm:$0xff] }
 0x2c2   : > { %v868_v6 = vadd.f32 %v860_v47, %v820_v13 }
 0x2c7   : > { %v832_v5 = vpop.permute.xlu1 %831 }
 0x2c8   : > { %v856_v14 = vmul.f32 %v832_v5, %v304_v16  ;;  %v876_v15 = vpop.permute.xlu2 %875  ;;  %v1773_v50 = vpop.permute.xlu0 %891 }
 0x2c9   : > { %v903_v52 = vmul.f32 %v876_v15, %v1771_v45  ;;  %1043 = vperm.xlu1 %1308, %v1699_v42   ;;  %1039 = vperm.xlu2 %1307, %v1697_v41  }
 0x2ca   : > { %v864_v51 = vadd.f32 %v856_v14, %v816_v24 }
 0x2cb   : > { %v911_v53 = vadd.f32 %v903_v52, %v863_v27 }
 0x2cf   : > { %v840_v54 = vpop.permute.xlu1 %839 }
 0x2d0   : > { %v858_v55 = vmul.f32 %v840_v54, %v304_v16  ;;  %v884_v56 = vpop.permute.xlu2 %883 }
 0x2d1   : > { %v905_v57 = vmul.f32 %v884_v56, %v1771_v45  ;;  %1311 = vset.pattern.permute.xlu1 %v1375_v49  ;;  %1310 = vset.pattern.permute.xlu2 %v1375_v49  ;;  %v920_v3 = vpop.permute.xlu0 %919 }
 0x2d2   : > { %v866_v9 = vadd.f32 %v858_v55, %v818_v38  ;;  %1071 = vperm.xlu1 %1311, %v1685_v31   ;;  %1067 = vperm.xlu2 %1310, %v1683_v23   ;;  %v950_v36 = vmul.f32 %v920_v3, %v306_v26  ;;  %v910_v38 = vadd.f32 %v902_v8, %v1759_v28 }
 0x2d3   : > { %v913_v29 = vadd.f32 %v905_v57, %v865_v39 }
 0x2d4   : > { %v958_v43 = vadd.f32 %v950_v36, %v910_v38 }
 0x2d7   : > { %v852_v58 = vpop.permute.xlu1 %851 }
 0x2d8   : > { %v861_v61 = vmul.f32 %v852_v58, %v304_v16  ;;  %v896_v62 = vpop.permute.xlu2 %895 }
 0x2d9   : > { %v908_v63 = vmul.f32 %v896_v62, %v1771_v45  ;;  %v940_v0 = vpop.permute.xlu0 %939 }
 0x2da   : > { %v869_v1 = vadd.f32 %v861_v61, %v821_v30  ;;  %1079 = vperm.xlu1 %1311, %v1690_v35   ;;  %1075 = vperm.xlu2 %1310, %v1681_v25   ;;  %v955_v52 = vmul.f32 %v940_v0, %v306_v26 }
 0x2db   : > { %v916_v49 = vadd.f32 %v908_v63, %v868_v6  ;;  %v907_v6 = vmul.f32 %v1773_v50, %v1771_v45 }
 0x2e0   : > { %v880_v2 = vpop.permute.xlu1 %879 }
 0x2e1   : > { %v904_v4 = vmul.f32 %v880_v2, %v1771_v45  ;;  %v924_v31 = vpop.permute.xlu2 %923 }
 0x2e2   : > { %v951_v7 = vmul.f32 %v924_v31, %v306_v26  ;;  %1091 = vperm.xlu1 %1311, %v1699_v42   ;;  %1087 = vperm.xlu2 %1310, %v1697_v41   ;;  %v968_v23 = vpop.permute.xlu0 %967 }
 0x2e3   : > { %v912_v59 = vadd.f32 %v904_v4, %v864_v51  ;;  %v998_v39 = vmul.f32 %v968_v23, %v1801_v33 }
 0x2e4   : > { %v1790_v10 = vadd.f32 %v951_v7, %v911_v53  ;;  %v915_v53 = vadd.f32 %v907_v6, %v1766_v40 }
 0x2e5   : > { %v1006_v5 = vadd.f32 %v998_v39, %v958_v43 }
 0x2e6   : > { %v963_v50 = vadd.f32 %v955_v52, %v915_v53 }
 0x2e8   : > { %v888_v11 = vpop.permute.xlu1 %887 }
 0x2e9   : > { %v906_v35 = vmul.f32 %v888_v11, %v1771_v45  ;;  %v932_v60 = vpop.permute.xlu2 %931 }
 0x2ea   : > { %v953_v25 = vmul.f32 %v932_v60, %v306_v26  ;;  %v988_v12 = vpop.permute.xlu0 %987 }
 0x2eb   : > { %v914_v13 = vadd.f32 %v906_v35, %v866_v9  ;;  %v1003_v54 = vmul.f32 %v988_v12, %v1801_v33 }
 0x2ec   : > { %v1793_v16 = vadd.f32 %v953_v25, %v913_v29 }
 0x2ed   : > { %v1011_v9 = vadd.f32 %v1003_v54, %v963_v50 }
 0x2f0   : > { %v900_v17 = vpop.permute.xlu1 %899 }
 0x2f1   : > { %v909_v42 = vmul.f32 %v900_v17, %v1771_v45  ;;  %v944_v41 = vpop.permute.xlu2 %943 }
 0x2f2   : > { %v956_v18 = vmul.f32 %v944_v41, %v306_v26 }
 0x2f3   : > { %v917_v19 = vadd.f32 %v909_v42, %v869_v1  ;;  %v1016_v20 = vpop.permute.xlu0 %1015 }
 0x2f4   : > { %v1796_v21 = vadd.f32 %v956_v18, %v916_v49  ;;  %v1046_v44 = vmul.f32 %v1016_v20, %v1804_v37 }
 0x2f6   : > { %v1054_v28 = vadd.f32 %v1046_v44, %v1006_v5 }
 0x2f9   : > { %v928_v22 = vpop.permute.xlu1 %927 }
 0x2fa   : > { %v952_v24 = vmul.f32 %v928_v22, %v306_v26  ;;  %v972_v27 = vpop.permute.xlu2 %971 }
 0x2fb   : > { %v1036_v32 = vpop.permute.xlu0 %1035  ;;  %v999_v35 = vmul.f32 %v972_v27, %v1801_v33 }
 0x2fc   : > { %v960_v34 = vadd.f32 %v952_v24, %v912_v59  ;;  %v1051_v55 = vmul.f32 %v1036_v32, %v1804_v37 }
 0x2fd   : > { %v1007_v25 = vadd.f32 %v999_v35, %v1790_v10 }
 0x2fe   : > { %v1059_v61 = vadd.f32 %v1051_v55, %v1011_v9 }
 0x301   : > { %v936_v46 = vpop.permute.xlu1 %935 }
 0x302   : > { %v954_v47 = vmul.f32 %v936_v46, %v306_v26  ;;  %v980_v30 = vpop.permute.xlu2 %979 }
 0x303   : > { %v1001_v41 = vmul.f32 %v980_v30, %v1801_v33 }
 0x304   : > { %v962_v14 = vadd.f32 %v954_v47, %v914_v13  ;;  %v1064_v15 = vpop.permute.xlu0 %1063 }
 0x305   : > { %v1094_v51 = vmul.f32 %v1064_v15, %v1811_v48  ;;  %v1009_v20 = vadd.f32 %v1001_v41, %v1793_v16 }
 0x307   : > { %v1102_v45 = vadd.f32 %v1094_v51, %v1054_v28 }
 0x309   : > { %1110 = vst.msk [vmem:[%s1819_s7] sm:$0xff] %vm318_vm0, %v1102_v45  ;;  %v948_v56 = vpop.permute.xlu1 %947 }
 0x30a   : > { %v957_v57 = vmul.f32 %v948_v56, %v306_v26  ;;  %v992_v3 = vpop.permute.xlu2 %991 }
 0x30b   : > { %v1004_v8 = vmul.f32 %v992_v3, %v1801_v33 }
 0x30c   : > { %v965_v29 = vadd.f32 %v957_v57, %v917_v19  ;;  %v1084_v58 = vpop.permute.xlu0 %1083 }
 0x30d   : > { %v1099_v62 = vmul.f32 %v1084_v58, %v1811_v48  ;;  %v1012_v36 = vadd.f32 %v1004_v8, %v1796_v21 }
 0x30f   : > { %v1107_v63 = vadd.f32 %v1099_v62, %v1059_v61 }
 0x311   : > { %1115 = vst.msk [vmem:[%s1819_s7 + $0x28] sm:$0xff] %vm318_vm0, %v1107_v63 }
 0x312   : > { %v976_v40 = vpop.permute.xlu1 %975 }
 0x313   : > { %v1000_v0 = vmul.f32 %v976_v40, %v1801_v33  ;;  %v1020_v1 = vpop.permute.xlu2 %1019 }
 0x314   : > { %v1047_v60 = vmul.f32 %v1020_v1, %v1804_v37 }
 0x315   : > { %v1008_v49 = vadd.f32 %v1000_v0, %v960_v34 }
 0x316   : > { %v1055_v17 = vadd.f32 %v1047_v60, %v1007_v25 }
 0x31a   : > { %v984_v2 = vpop.permute.xlu1 %983 }
 0x31b   : > { %v1002_v4 = vmul.f32 %v984_v2, %v1801_v33  ;;  %v1028_v31 = vpop.permute.xlu2 %1027 }
 0x31c   : > { %v1049_v19 = vmul.f32 %v1028_v31, %v1804_v37 }
 0x31d   : > { %v1010_v26 = vadd.f32 %v1002_v4, %v962_v14 }
 0x31e   : > { %v1057_v27 = vadd.f32 %v1049_v19, %v1009_v20 }
 0x322   : > { %v996_v7 = vpop.permute.xlu1 %995 }
 0x323   : > { %v1005_v23 = vmul.f32 %v996_v7, %v1801_v33  ;;  %v1040_v59 = vpop.permute.xlu2 %1039 }
 0x324   : > { %v1052_v34 = vmul.f32 %v1040_v59, %v1804_v37 }
 0x325   : > { %v1013_v11 = vadd.f32 %v1005_v23, %v965_v29 }
 0x326   : > { %v1060_v43 = vadd.f32 %v1052_v34, %v1012_v36 }
 0x32b   : > { %v1024_v12 = vpop.permute.xlu1 %1023 }
 0x32c   : > { %v1068_v13 = vpop.permute.xlu2 %1067  ;;  %v1048_v46 = vmul.f32 %v1024_v12, %v1804_v37 }
 0x32d   : > { %v1095_v42 = vmul.f32 %v1068_v13, %v1811_v48 }
 0x32e   : > { %v1056_v47 = vadd.f32 %v1048_v46, %v1008_v49 }
 0x32f   : > { %v1103_v18 = vadd.f32 %v1095_v42, %v1055_v17 }
 0x331   : > { %1111 = vst.msk [vmem:[%s1819_s7 + $0x8] sm:$0xff] %vm318_vm0, %v1103_v18 }
 0x333   : > { %v1032_v22 = vpop.permute.xlu1 %1031 }
 0x334   : > { %v1076_v24 = vpop.permute.xlu2 %1075  ;;  %v1050_v5 = vmul.f32 %v1032_v22, %v1804_v37 }
 0x335   : > { %v1097_v10 = vmul.f32 %v1076_v24, %v1811_v48 }
 0x336   : > { %v1058_v14 = vadd.f32 %v1050_v5, %v1010_v26 }
 0x337   : > { %v1105_v32 = vadd.f32 %v1097_v10, %v1057_v27 }
 0x339   : > { %1113 = vst.msk [vmem:[%s1819_s7 + $0x18] sm:$0xff] %vm318_vm0, %v1105_v32 }
 0x33b   : > { %v1044_v38 = vpop.permute.xlu1 %1043 }
 0x33c   : > { %v1088_v39 = vpop.permute.xlu2 %1087  ;;  %v1053_v28 = vmul.f32 %v1044_v38, %v1804_v37 }
 0x33d   : > { %v1100_v16 = vmul.f32 %v1088_v39, %v1811_v48 }
 0x33e   : > { %v1061_v53 = vadd.f32 %v1053_v28, %v1013_v11 }
 0x33f   : > { %v1108_v44 = vadd.f32 %v1100_v16, %v1060_v43 }
 0x341   : > { %1116 = vst.msk [vmem:[%s1819_s7 + $0x30] sm:$0xff] %vm318_vm0, %v1108_v44 }
 0x344   : > { %v1072_v33 = vpop.permute.xlu1 %1071 }
 0x345   : > { %v1096_v30 = vmul.f32 %v1072_v33, %v1811_v48 }
 0x347   : > { %v1104_v6 = vadd.f32 %v1096_v30, %v1056_v47 }
 0x349   : > { %1112 = vst.msk [vmem:[%s1819_s7 + $0x10] sm:$0xff] %vm318_vm0, %v1104_v6 }
 0x34c   : > { %v1080_v21 = vpop.permute.xlu1 %1079 }
 0x34d   : > { %v1098_v15 = vmul.f32 %v1080_v21, %v1811_v48 }
 0x34f   : > { %v1106_v52 = vadd.f32 %v1098_v15, %v1058_v14 }
 0x351   : > { %1114 = vst.msk [vmem:[%s1819_s7 + $0x20] sm:$0xff] %vm318_vm0, %v1106_v52 }
 0x354   : > { %v1092_v51 = vpop.permute.xlu1 %1091 }
 0x355   : > { %v1101_v54 = vmul.f32 %v1092_v51, %v1811_v48 }
 0x357   : > { %v1109_v45 = vadd.f32 %v1101_v54, %v1061_v53 }
 0x359   : > { %1117 = vst.msk [vmem:[%s1819_s7 + $0x38] sm:$0xff] %vm318_vm0, %v1109_v45 }
 0x35a PF: > { %s13_s14 = sadd.s32 1, %s1366_s14   ;;  %s1875_s12 = smov %s1362_s13 }
 0x35b   : > { %p10_p8 = scmp.ge.s32.totalorder %s13_s14, 4   ;;  %s1876_s13 = smov %s1878_s15 }
 0x35d   :  { %12 = sbr.rel (!%p10_p8) target bundleno = 2 (0x2), region = 68 }

</bundles_post_ra>
